<compile_context>
chip_gen: v5e
topology: v5e:2x2
jax: 0.10.0
libtpu: 0.0.40
codegen_flags: <defaults>
</compile_context>

<pallas_src>
import math
import functools

import jax
import jax.numpy as jnp
from jax.experimental import pallas as pl
from jax.experimental.pallas import tpu as pltpu

# ----- small GPTConfig -----
VOCAB = 128
BLOCK_SIZE = 16
N_LAYER = 2
N_HEAD = 2
N_EMBD = 32
PADDING_TOKEN_INDEX = 0   # tokenizer.PADDING_TOKEN_INDEX (external global in the reference)


# ----------------- in-kernel math helpers (f32 elementwise) -----------------
def _layernorm(x, w, b, eps=1e-5):
    mu = jnp.mean(x, axis=-1, keepdims=True)
    var = jnp.mean(jnp.square(x - mu), axis=-1, keepdims=True)
    return (x - mu) * jax.lax.rsqrt(var + eps) * w + b


def _gelu_tanh(x):
    c = math.sqrt(2.0 / math.pi)
    return 0.5 * x * (1.0 + jnp.tanh(c * (x + 0.044715 * x * x * x)))


# ----------------- fused whole-model Pallas kernel -----------------
def gpt_kernel(tok_ref, mask_ref, wte_ref, wte_t_ref, wpe_ref,
               ln1w_ref, ln1b_ref,
               wq_ref, wk_ref, wv_ref, bq_ref, bk_ref, bv_ref,
               wpr_ref, bpr_ref, ln2w_ref, ln2b_ref,
               wfc_ref, bfc_ref, wf2_ref, bf2_ref,
               lnfw_ref, lnfb_ref, out_ref, *, n_head):
    B, _, T = mask_ref.shape
    V, C = wte_ref.shape
    L = wq_ref.shape[0]
    hd = C // n_head
    scale = 1.0 / math.sqrt(hd)
    bf16 = jnp.bfloat16
    f32 = jnp.float32

    # --- token embedding as a one-hot MXU matmul (gather folded into kernel) ---
    tok = tok_ref[...]                                            # (B*T, 1) int32
    iota = jax.lax.broadcasted_iota(jnp.int32, (B * T, V), 1)     # lane-dim iota
    onehot = jnp.where(tok == iota, 1.0, 0.0).astype(bf16)        # (B*T, V) lane-dense
    tok_emb = jnp.dot(onehot, wte_ref[...],                       # wte already bf16
                      preferred_element_type=f32)                 # (B*T, C) f32
    x = tok_emb.reshape(B, T, C) + wpe_ref[0:T, :]                # + positional emb

    # Additive float mask, exactly as torch SDPA applies a float attn_mask.
    # NOTE: this is the reference's 0/1 mask (adds +1 to non-pad key scores),
    # faithfully reproduced — it does NOT apply a -inf bias to pad keys.
    # Broadcast ONCE (JAX does not CSE broadcast_in_dim inside loops).
    mask = jnp.broadcast_to(mask_ref[...], (B, T, T))             # (B, T, T) f32

    for l in range(L):
        # ---------- self-attention branch (is_causal=False path) ----------
        h = _layernorm(x, ln1w_ref[l], ln1b_ref[l])
        h2 = h.reshape(B * T, C).astype(bf16)
        acc = jnp.zeros((B * T, C), f32)
        for hh in range(n_head):
            s0, s1 = hh * hd, (hh + 1) * hd
            # per-head projections via static slices of the (bf16) WEIGHT refs
            q = (jnp.dot(h2, wq_ref[l, :, s0:s1], preferred_element_type=f32)
                 + bq_ref[l, :, s0:s1]).reshape(B, T, hd)
            k = (jnp.dot(h2, wk_ref[l, :, s0:s1], preferred_element_type=f32)
                 + bk_ref[l, :, s0:s1]).reshape(B, T, hd)
            v = (jnp.dot(h2, wv_ref[l, :, s0:s1], preferred_element_type=f32)
                 + bv_ref[l, :, s0:s1]).reshape(B, T, hd)

            s = jnp.einsum('bqd,bkd->bqk', q.astype(bf16), k.astype(bf16),
                           preferred_element_type=f32) * scale    # (B, T, T)
            s = s + mask                                          # additive float mask
            s = s - jnp.max(s, axis=-1, keepdims=True)
            p = jnp.exp(s)
            p = p * pl.reciprocal(jnp.sum(p, axis=-1, keepdims=True), approx=True)
            yh = jnp.einsum('bqk,bkd->bqd', p.astype(bf16), v.astype(bf16),
                            preferred_element_type=f32)           # (B, T, hd)
            # fold head-concat into the output projection via weight row-slices
            acc = acc + jnp.dot(yh.reshape(B * T, hd).astype(bf16),
                                wpr_ref[l, s0:s1, :],
                                preferred_element_type=f32)
        x = x + (acc + bpr_ref[l]).reshape(B, T, C)

        # ---------- MLP branch ----------
        h = _layernorm(x, ln2w_ref[l], ln2b_ref[l])
        f = jnp.dot(h.reshape(B * T, C).astype(bf16), wfc_ref[l],
                    preferred_element_type=f32) + bfc_ref[l]
        f = _gelu_tanh(f)
        f = jnp.dot(f.astype(bf16), wf2_ref[l],
                    preferred_element_type=f32) + bf2_ref[l]
        x = x + f.reshape(B, T, C)

    # ---------- final LayerNorm + weight-tied lm_head (pre-transposed) ----------
    xn = _layernorm(x, lnfw_ref[...], lnfb_ref[...])
    logits = jnp.dot(xn.reshape(B * T, C).astype(bf16), wte_t_ref[...],
                     preferred_element_type=f32)                  # (B*T, V), V lane-dense
    out_ref[...] = logits.reshape(B, T, V)


# ----------------- wrapper -----------------
def gpt_forward(tokens, params, attention_mask=None, is_training=False):
    B, T = tokens.shape
    assert T <= BLOCK_SIZE, f'Sequence length exceeds block_size={BLOCK_SIZE}'
    # TODO(synk): is_training=True (torch SDPA is_causal path) is not implemented;
    # the reference default (is_training=False, additive float mask) is what runs here.
    if attention_mask is None:
        attention_mask = (tokens != PADDING_TOKEN_INDEX)
    attention_mask = jnp.asarray(attention_mask, jnp.float32).reshape(B, 1, T)

    tok_col = tokens.reshape(B * T, 1).astype(jnp.int32)

    bf16 = jnp.bfloat16
    wte = params['wte']
    wte_bf = wte.astype(bf16)           # embedding matmul operand (cast once)
    wte_t = wte.T.astype(bf16)          # pre-transpose + cast tied lm_head once

    ins = (tok_col, attention_mask, wte_bf, wte_t, params['wpe'],
           params['ln1_w'], params['ln1_b'],
           params['w_q'].astype(bf16), params['w_k'].astype(bf16),
           params['w_v'].astype(bf16),
           params['b_q'], params['b_k'], params['b_v'],
           params['w_proj'].astype(bf16), params['b_proj'],
           params['ln2_w'], params['ln2_b'],
           params['w_fc'].astype(bf16), params['b_fc'],
           params['w_fc2'].astype(bf16), params['b_fc2'],
           params['ln_f_w'], params['ln_f_b'])

    return pl.pallas_call(
        functools.partial(gpt_kernel, n_head=N_HEAD),
        out_shape=jax.ShapeDtypeStruct((B, T, VOCAB), jnp.float32),
        in_specs=[pl.BlockSpec(memory_space=pltpu.MemorySpace.VMEM)] * len(ins),
        out_specs=pl.BlockSpec(memory_space=pltpu.MemorySpace.VMEM),
    )(*ins)


# ----------------- deterministic parameter init (stacked per-layer arrays) -----------------
def init_params(key):
    D, V, L = N_EMBD, VOCAB, N_LAYER
    std = 0.02
    proj_std = std * (2 * L) ** (-0.5)    # NANOGPT_SCALE_INIT layers
    ks = iter(jax.random.split(key, 2 + 6 * L))

    def nrm(shape, s):
        return s * jax.random.normal(next(ks), shape, jnp.float32)

    params = {
        'wte': nrm((V, D), std),
        'wpe': nrm((BLOCK_SIZE, D), std),
        'ln_f_w': jnp.ones((1, 1, D), jnp.float32),
        'ln_f_b': jnp.zeros((1, 1, D), jnp.float32),
        # stacked per-layer params (leading axis = layer)
        'ln1_w': jnp.ones((L, 1, 1, D), jnp.float32),
        'ln1_b': jnp.zeros((L, 1, 1, D), jnp.float32),
        'w_q': nrm((L, D, D), std),
        'w_k': nrm((L, D, D), std),
        'w_v': nrm((L, D, D), std),
        'b_q': jnp.zeros((L, 1, D), jnp.float32),
        'b_k': jnp.zeros((L, 1, D), jnp.float32),
        'b_v': jnp.zeros((L, 1, D), jnp.float32),
        'w_proj': nrm((L, D, D), proj_std),
        'b_proj': jnp.zeros((L, 1, D), jnp.float32),
        'ln2_w': jnp.ones((L, 1, 1, D), jnp.float32),
        'ln2_b': jnp.zeros((L, 1, 1, D), jnp.float32),
        'w_fc': nrm((L, D, 4 * D), std),
        'b_fc': jnp.zeros((L, 1, 4 * D), jnp.float32),
        'w_fc2': nrm((L, 4 * D, D), proj_std),
        'b_fc2': jnp.zeros((L, 1, D), jnp.float32),
    }
    return params


if __name__ == "__main__":
    key = jax.random.PRNGKey(0)
    pkey, tkey = jax.random.split(key)
    params = init_params(pkey)

    B, T = 2, 8
    tokens = jax.random.randint(tkey, (B, T), 0, VOCAB, dtype=jnp.int32)

    fwd = jax.jit(gpt_forward)            # fuses the tiny wrapper ops around the one kernel
    logits = fwd(tokens, params)          # targets=None -> loss is None in the reference
    logits = jax.block_until_ready(logits)

    assert logits.shape == (B, T, VOCAB), logits.shape
    assert bool(jnp.all(jnp.isfinite(logits)))
    print("KERNEL_OK")
</pallas_src>

<mosaic_0001>
module attributes {stable_mosaic.version = 11 : i64} {
  func.func @gpt_kernel(%arg0: memref<16x1xi32, #tpu.memory_space<vmem>>, %arg1: memref<2x1x8xf32, #tpu.memory_space<vmem>>, %arg2: memref<128x32xbf16, #tpu.memory_space<vmem>>, %arg3: memref<32x128xbf16, #tpu.memory_space<vmem>>, %arg4: memref<16x32xf32, #tpu.memory_space<vmem>>, %arg5: memref<2x1x1x32xf32, #tpu.memory_space<vmem>>, %arg6: memref<2x1x1x32xf32, #tpu.memory_space<vmem>>, %arg7: memref<2x32x32xbf16, #tpu.memory_space<vmem>>, %arg8: memref<2x32x32xbf16, #tpu.memory_space<vmem>>, %arg9: memref<2x32x32xbf16, #tpu.memory_space<vmem>>, %arg10: memref<2x1x32xf32, #tpu.memory_space<vmem>>, %arg11: memref<2x1x32xf32, #tpu.memory_space<vmem>>, %arg12: memref<2x1x32xf32, #tpu.memory_space<vmem>>, %arg13: memref<2x32x32xbf16, #tpu.memory_space<vmem>>, %arg14: memref<2x1x32xf32, #tpu.memory_space<vmem>>, %arg15: memref<2x1x1x32xf32, #tpu.memory_space<vmem>>, %arg16: memref<2x1x1x32xf32, #tpu.memory_space<vmem>>, %arg17: memref<2x32x128xbf16, #tpu.memory_space<vmem>>, %arg18: memref<2x1x128xf32, #tpu.memory_space<vmem>>, %arg19: memref<2x128x32xbf16, #tpu.memory_space<vmem>>, %arg20: memref<2x1x32xf32, #tpu.memory_space<vmem>>, %arg21: memref<1x1x32xf32, #tpu.memory_space<vmem>>, %arg22: memref<1x1x32xf32, #tpu.memory_space<vmem>>, %arg23: memref<2x8x128xf32, #tpu.memory_space<vmem>>) attributes {dimension_semantics = [], scalar_prefetch = 0 : i64, scratch_operands = 0 : i64, tpu.core_type = #tpu.core_type<tc>} {
    %c0 = arith.constant 0 : index
    %c0_0 = arith.constant 0 : index
    %0 = vector.load %arg0[%c0, %c0_0] : memref<16x1xi32, #tpu.memory_space<vmem>>, vector<16x1xi32>
    %1 = tpu.iota {dimensions = array<i32: 1>} : vector<16x128xi32>
    %2 = vector.broadcast %0 : vector<16x1xi32> to vector<16x128xi32>
    %3 = arith.cmpi eq, %2, %1 : vector<16x128xi32>
    %cst = arith.constant 1.000000e+00 : f32
    %cst_1 = arith.constant 0.000000e+00 : f32
    %4 = vector.broadcast %cst : f32 to vector<16x128xf32>
    %5 = vector.broadcast %cst_1 : f32 to vector<16x128xf32>
    %6 = arith.select %3, %4, %5 : vector<16x128xi1>, vector<16x128xf32>
    %7 = arith.truncf %6 : vector<16x128xf32> to vector<16x128xbf16>
    %c0_2 = arith.constant 0 : index
    %c0_3 = arith.constant 0 : index
    %8 = vector.load %arg2[%c0_2, %c0_3] : memref<128x32xbf16, #tpu.memory_space<vmem>>, vector<128x32xbf16>
    %cst_4 = arith.constant dense<0.000000e+00> : vector<16x32xf32>
    %9 = tpu.matmul %7, %8, %cst_4 {dimension_numbers = #tpu.dot_dimension_numbers<[1], [0], [0], [1], [0, 0, 1, 1], [], []>} : vector<16x128xbf16>, vector<128x32xbf16>, vector<16x32xf32> -> vector<16x32xf32>
    %10 = vector.shape_cast %9 : vector<16x32xf32> to vector<2x8x32xf32>
    %c0_5 = arith.constant 0 : index
    %c0_6 = arith.constant 0 : index
    %11 = vector.load %arg4[%c0_5, %c0_6] : memref<16x32xf32, #tpu.memory_space<vmem>>, vector<8x32xf32>
    %12 = vector.shape_cast %11 : vector<8x32xf32> to vector<1x8x32xf32>
    %13 = vector.broadcast %12 : vector<1x8x32xf32> to vector<2x8x32xf32>
    %14 = arith.addf %10, %13 : vector<2x8x32xf32>
    %c0_7 = arith.constant 0 : index
    %c0_8 = arith.constant 0 : index
    %c0_9 = arith.constant 0 : index
    %15 = vector.load %arg1[%c0_7, %c0_8, %c0_9] : memref<2x1x8xf32, #tpu.memory_space<vmem>>, vector<2x1x8xf32>
    %16 = vector.shape_cast %15 : vector<2x1x8xf32> to vector<2x1x8xf32>
    %17 = vector.broadcast %16 : vector<2x1x8xf32> to vector<2x8x8xf32>
    %c0_10 = arith.constant 0 : index
    %c0_11 = arith.constant 0 : index
    %c0_12 = arith.constant 0 : index
    %c0_13 = arith.constant 0 : index
    %18 = vector.load %arg5[%c0_10, %c0_11, %c0_12, %c0_13] : memref<2x1x1x32xf32, #tpu.memory_space<vmem>>, vector<1x1x1x32xf32>
    %19 = vector.shape_cast %18 : vector<1x1x1x32xf32> to vector<1x1x32xf32>
    %c0_14 = arith.constant 0 : index
    %c0_15 = arith.constant 0 : index
    %c0_16 = arith.constant 0 : index
    %c0_17 = arith.constant 0 : index
    %20 = vector.load %arg6[%c0_14, %c0_15, %c0_16, %c0_17] : memref<2x1x1x32xf32, #tpu.memory_space<vmem>>, vector<1x1x1x32xf32>
    %21 = vector.shape_cast %20 : vector<1x1x1x32xf32> to vector<1x1x32xf32>
    %cst_18 = arith.constant dense<0.000000e+00> : vector<2x8xf32>
    %22 = vector.multi_reduction <add>, %14, %cst_18 [2] : vector<2x8x32xf32> to vector<2x8xf32>
    %23 = vector.shape_cast %22 : vector<2x8xf32> to vector<2x8x1xf32>
    %cst_19 = arith.constant 3.200000e+01 : f32
    %24 = vector.broadcast %cst_19 : f32 to vector<2x8x1xf32>
    %25 = arith.divf %23, %24 : vector<2x8x1xf32>
    %26 = vector.broadcast %25 : vector<2x8x1xf32> to vector<2x8x32xf32>
    %27 = arith.subf %14, %26 : vector<2x8x32xf32>
    %28 = arith.mulf %27, %27 : vector<2x8x32xf32>
    %cst_20 = arith.constant dense<0.000000e+00> : vector<2x8xf32>
    %29 = vector.multi_reduction <add>, %28, %cst_20 [2] : vector<2x8x32xf32> to vector<2x8xf32>
    %30 = vector.shape_cast %29 : vector<2x8xf32> to vector<2x8x1xf32>
    %cst_21 = arith.constant 3.200000e+01 : f32
    %31 = vector.broadcast %cst_21 : f32 to vector<2x8x1xf32>
    %32 = arith.divf %30, %31 : vector<2x8x1xf32>
    %33 = vector.broadcast %25 : vector<2x8x1xf32> to vector<2x8x32xf32>
    %34 = arith.subf %14, %33 : vector<2x8x32xf32>
    %cst_22 = arith.constant 9.99999974E-6 : f32
    %35 = vector.broadcast %cst_22 : f32 to vector<2x8x1xf32>
    %36 = arith.addf %32, %35 : vector<2x8x1xf32>
    %37 = math.rsqrt %36 : vector<2x8x1xf32>
    %38 = vector.broadcast %37 : vector<2x8x1xf32> to vector<2x8x32xf32>
    %39 = arith.mulf %34, %38 : vector<2x8x32xf32>
    %40 = vector.broadcast %19 : vector<1x1x32xf32> to vector<2x8x32xf32>
    %41 = arith.mulf %39, %40 : vector<2x8x32xf32>
    %42 = vector.broadcast %21 : vector<1x1x32xf32> to vector<2x8x32xf32>
    %43 = arith.addf %41, %42 : vector<2x8x32xf32>
    %44 = vector.shape_cast %43 : vector<2x8x32xf32> to vector<16x32xf32>
    %45 = arith.truncf %44 : vector<16x32xf32> to vector<16x32xbf16>
    %cst_23 = arith.constant 0.000000e+00 : f32
    %46 = vector.broadcast %cst_23 : f32 to vector<16x32xf32>
    %c0_24 = arith.constant 0 : index
    %c0_25 = arith.constant 0 : index
    %c0_26 = arith.constant 0 : index
    %47 = vector.load %arg7[%c0_24, %c0_25, %c0_26] : memref<2x32x32xbf16, #tpu.memory_space<vmem>>, vector<1x32x16xbf16>
    %48 = vector.shape_cast %47 : vector<1x32x16xbf16> to vector<32x16xbf16>
    %cst_27 = arith.constant dense<0.000000e+00> : vector<16x16xf32>
    %49 = tpu.matmul %45, %48, %cst_27 {dimension_numbers = #tpu.dot_dimension_numbers<[1], [0], [0], [1], [0, 0, 1, 1], [], []>} : vector<16x32xbf16>, vector<32x16xbf16>, vector<16x16xf32> -> vector<16x16xf32>
    %c0_28 = arith.constant 0 : index
    %c0_29 = arith.constant 0 : index
    %c0_30 = arith.constant 0 : index
    %50 = vector.load %arg10[%c0_28, %c0_29, %c0_30] : memref<2x1x32xf32, #tpu.memory_space<vmem>>, vector<1x1x16xf32>
    %51 = vector.shape_cast %50 : vector<1x1x16xf32> to vector<1x16xf32>
    %52 = vector.broadcast %51 : vector<1x16xf32> to vector<16x16xf32>
    %53 = arith.addf %49, %52 : vector<16x16xf32>
    %54 = vector.shape_cast %53 : vector<16x16xf32> to vector<2x8x16xf32>
    %c0_31 = arith.constant 0 : index
    %c0_32 = arith.constant 0 : index
    %c0_33 = arith.constant 0 : index
    %55 = vector.load %arg8[%c0_31, %c0_32, %c0_33] : memref<2x32x32xbf16, #tpu.memory_space<vmem>>, vector<1x32x16xbf16>
    %56 = vector.shape_cast %55 : vector<1x32x16xbf16> to vector<32x16xbf16>
    %cst_34 = arith.constant dense<0.000000e+00> : vector<16x16xf32>
    %57 = tpu.matmul %45, %56, %cst_34 {dimension_numbers = #tpu.dot_dimension_numbers<[1], [0], [0], [1], [0, 0, 1, 1], [], []>} : vector<16x32xbf16>, vector<32x16xbf16>, vector<16x16xf32> -> vector<16x16xf32>
    %c0_35 = arith.constant 0 : index
    %c0_36 = arith.constant 0 : index
    %c0_37 = arith.constant 0 : index
    %58 = vector.load %arg11[%c0_35, %c0_36, %c0_37] : memref<2x1x32xf32, #tpu.memory_space<vmem>>, vector<1x1x16xf32>
    %59 = vector.shape_cast %58 : vector<1x1x16xf32> to vector<1x16xf32>
    %60 = vector.broadcast %59 : vector<1x16xf32> to vector<16x16xf32>
    %61 = arith.addf %57, %60 : vector<16x16xf32>
    %62 = vector.shape_cast %61 : vector<16x16xf32> to vector<2x8x16xf32>
    %c0_38 = arith.constant 0 : index
    %c0_39 = arith.constant 0 : index
    %c0_40 = arith.constant 0 : index
    %63 = vector.load %arg9[%c0_38, %c0_39, %c0_40] : memref<2x32x32xbf16, #tpu.memory_space<vmem>>, vector<1x32x16xbf16>
    %64 = vector.shape_cast %63 : vector<1x32x16xbf16> to vector<32x16xbf16>
    %cst_41 = arith.constant dense<0.000000e+00> : vector<16x16xf32>
    %65 = tpu.matmul %45, %64, %cst_41 {dimension_numbers = #tpu.dot_dimension_numbers<[1], [0], [0], [1], [0, 0, 1, 1], [], []>} : vector<16x32xbf16>, vector<32x16xbf16>, vector<16x16xf32> -> vector<16x16xf32>
    %c0_42 = arith.constant 0 : index
    %c0_43 = arith.constant 0 : index
    %c0_44 = arith.constant 0 : index
    %66 = vector.load %arg12[%c0_42, %c0_43, %c0_44] : memref<2x1x32xf32, #tpu.memory_space<vmem>>, vector<1x1x16xf32>
    %67 = vector.shape_cast %66 : vector<1x1x16xf32> to vector<1x16xf32>
    %68 = vector.broadcast %67 : vector<1x16xf32> to vector<16x16xf32>
    %69 = arith.addf %65, %68 : vector<16x16xf32>
    %70 = vector.shape_cast %69 : vector<16x16xf32> to vector<2x8x16xf32>
    %71 = arith.truncf %54 : vector<2x8x16xf32> to vector<2x8x16xbf16>
    %72 = arith.truncf %62 : vector<2x8x16xf32> to vector<2x8x16xbf16>
    "tpu.trace_start"() <{level = 10 : i32, message = "bqd,bkd->bqk"}> : () -> ()
    %cst_45 = arith.constant dense<0.000000e+00> : vector<2x8x8xf32>
    %73 = tpu.matmul %71, %72, %cst_45 {dimension_numbers = #tpu.dot_dimension_numbers<[2], [2], [1], [1], [0, 0, 0, 1, 1, 1], [0], [0]>} : vector<2x8x16xbf16>, vector<2x8x16xbf16>, vector<2x8x8xf32> -> vector<2x8x8xf32>
    "tpu.trace_stop"() : () -> ()
    %cst_46 = arith.constant 2.500000e-01 : f32
    %74 = vector.broadcast %cst_46 : f32 to vector<2x8x8xf32>
    %75 = arith.mulf %73, %74 : vector<2x8x8xf32>
    %76 = arith.addf %75, %17 : vector<2x8x8xf32>
    %cst_47 = arith.constant dense<0xFF800000> : vector<2x8xf32>
    %77 = vector.multi_reduction <maximumf>, %76, %cst_47 [2] : vector<2x8x8xf32> to vector<2x8xf32>
    %78 = vector.shape_cast %77 : vector<2x8xf32> to vector<2x8x1xf32>
    %79 = vector.broadcast %78 : vector<2x8x1xf32> to vector<2x8x8xf32>
    %80 = arith.subf %76, %79 : vector<2x8x8xf32>
    %81 = math.exp %80 : vector<2x8x8xf32>
    %cst_48 = arith.constant dense<0.000000e+00> : vector<2x8xf32>
    %82 = vector.multi_reduction <add>, %81, %cst_48 [2] : vector<2x8x8xf32> to vector<2x8xf32>
    %83 = vector.shape_cast %82 : vector<2x8xf32> to vector<2x8x1xf32>
    %84 = tpu.reciprocal %83 {approx = true} : vector<2x8x1xf32> -> vector<2x8x1xf32>
    %85 = vector.broadcast %84 : vector<2x8x1xf32> to vector<2x8x8xf32>
    %86 = arith.mulf %81, %85 : vector<2x8x8xf32>
    %87 = arith.truncf %86 : vector<2x8x8xf32> to vector<2x8x8xbf16>
    %88 = arith.truncf %70 : vector<2x8x16xf32> to vector<2x8x16xbf16>
    "tpu.trace_start"() <{level = 10 : i32, message = "bqk,bkd->bqd"}> : () -> ()
    %cst_49 = arith.constant dense<0.000000e+00> : vector<2x8x16xf32>
    %89 = tpu.matmul %87, %88, %cst_49 {dimension_numbers = #tpu.dot_dimension_numbers<[2], [1], [1], [2], [0, 0, 0, 1, 1, 2], [0], [0]>} : vector<2x8x8xbf16>, vector<2x8x16xbf16>, vector<2x8x16xf32> -> vector<2x8x16xf32>
    "tpu.trace_stop"() : () -> ()
    %90 = vector.shape_cast %89 : vector<2x8x16xf32> to vector<16x16xf32>
    %91 = arith.truncf %90 : vector<16x16xf32> to vector<16x16xbf16>
    %c0_50 = arith.constant 0 : index
    %c0_51 = arith.constant 0 : index
    %c0_52 = arith.constant 0 : index
    %92 = vector.load %arg13[%c0_50, %c0_51, %c0_52] : memref<2x32x32xbf16, #tpu.memory_space<vmem>>, vector<1x16x32xbf16>
    %93 = vector.shape_cast %92 : vector<1x16x32xbf16> to vector<16x32xbf16>
    %cst_53 = arith.constant dense<0.000000e+00> : vector<16x32xf32>
    %94 = tpu.matmul %91, %93, %cst_53 {dimension_numbers = #tpu.dot_dimension_numbers<[1], [0], [0], [1], [0, 0, 1, 1], [], []>} : vector<16x16xbf16>, vector<16x32xbf16>, vector<16x32xf32> -> vector<16x32xf32>
    %95 = arith.addf %46, %94 : vector<16x32xf32>
    %c0_54 = arith.constant 0 : index
    %c0_55 = arith.constant 0 : index
    %c16 = arith.constant 16 : index
    %96 = vector.load %arg7[%c0_54, %c0_55, %c16] : memref<2x32x32xbf16, #tpu.memory_space<vmem>>, vector<1x32x16xbf16>
    %97 = vector.shape_cast %96 : vector<1x32x16xbf16> to vector<32x16xbf16>
    %cst_56 = arith.constant dense<0.000000e+00> : vector<16x16xf32>
    %98 = tpu.matmul %45, %97, %cst_56 {dimension_numbers = #tpu.dot_dimension_numbers<[1], [0], [0], [1], [0, 0, 1, 1], [], []>} : vector<16x32xbf16>, vector<32x16xbf16>, vector<16x16xf32> -> vector<16x16xf32>
    %c0_57 = arith.constant 0 : index
    %c0_58 = arith.constant 0 : index
    %c16_59 = arith.constant 16 : index
    %99 = vector.load %arg10[%c0_57, %c0_58, %c16_59] : memref<2x1x32xf32, #tpu.memory_space<vmem>>, vector<1x1x16xf32>
    %100 = vector.shape_cast %99 : vector<1x1x16xf32> to vector<1x16xf32>
    %101 = vector.broadcast %100 : vector<1x16xf32> to vector<16x16xf32>
    %102 = arith.addf %98, %101 : vector<16x16xf32>
    %103 = vector.shape_cast %102 : vector<16x16xf32> to vector<2x8x16xf32>
    %c0_60 = arith.constant 0 : index
    %c0_61 = arith.constant 0 : index
    %c16_62 = arith.constant 16 : index
    %104 = vector.load %arg8[%c0_60, %c0_61, %c16_62] : memref<2x32x32xbf16, #tpu.memory_space<vmem>>, vector<1x32x16xbf16>
    %105 = vector.shape_cast %104 : vector<1x32x16xbf16> to vector<32x16xbf16>
    %cst_63 = arith.constant dense<0.000000e+00> : vector<16x16xf32>
    %106 = tpu.matmul %45, %105, %cst_63 {dimension_numbers = #tpu.dot_dimension_numbers<[1], [0], [0], [1], [0, 0, 1, 1], [], []>} : vector<16x32xbf16>, vector<32x16xbf16>, vector<16x16xf32> -> vector<16x16xf32>
    %c0_64 = arith.constant 0 : index
    %c0_65 = arith.constant 0 : index
    %c16_66 = arith.constant 16 : index
    %107 = vector.load %arg11[%c0_64, %c0_65, %c16_66] : memref<2x1x32xf32, #tpu.memory_space<vmem>>, vector<1x1x16xf32>
    %108 = vector.shape_cast %107 : vector<1x1x16xf32> to vector<1x16xf32>
    %109 = vector.broadcast %108 : vector<1x16xf32> to vector<16x16xf32>
    %110 = arith.addf %106, %109 : vector<16x16xf32>
    %111 = vector.shape_cast %110 : vector<16x16xf32> to vector<2x8x16xf32>
    %c0_67 = arith.constant 0 : index
    %c0_68 = arith.constant 0 : index
    %c16_69 = arith.constant 16 : index
    %112 = vector.load %arg9[%c0_67, %c0_68, %c16_69] : memref<2x32x32xbf16, #tpu.memory_space<vmem>>, vector<1x32x16xbf16>
    %113 = vector.shape_cast %112 : vector<1x32x16xbf16> to vector<32x16xbf16>
    %cst_70 = arith.constant dense<0.000000e+00> : vector<16x16xf32>
    %114 = tpu.matmul %45, %113, %cst_70 {dimension_numbers = #tpu.dot_dimension_numbers<[1], [0], [0], [1], [0, 0, 1, 1], [], []>} : vector<16x32xbf16>, vector<32x16xbf16>, vector<16x16xf32> -> vector<16x16xf32>
    %c0_71 = arith.constant 0 : index
    %c0_72 = arith.constant 0 : index
    %c16_73 = arith.constant 16 : index
    %115 = vector.load %arg12[%c0_71, %c0_72, %c16_73] : memref<2x1x32xf32, #tpu.memory_space<vmem>>, vector<1x1x16xf32>
    %116 = vector.shape_cast %115 : vector<1x1x16xf32> to vector<1x16xf32>
    %117 = vector.broadcast %116 : vector<1x16xf32> to vector<16x16xf32>
    %118 = arith.addf %114, %117 : vector<16x16xf32>
    %119 = vector.shape_cast %118 : vector<16x16xf32> to vector<2x8x16xf32>
    %120 = arith.truncf %103 : vector<2x8x16xf32> to vector<2x8x16xbf16>
    %121 = arith.truncf %111 : vector<2x8x16xf32> to vector<2x8x16xbf16>
    "tpu.trace_start"() <{level = 10 : i32, message = "bqd,bkd->bqk"}> : () -> ()
    %cst_74 = arith.constant dense<0.000000e+00> : vector<2x8x8xf32>
    %122 = tpu.matmul %120, %121, %cst_74 {dimension_numbers = #tpu.dot_dimension_numbers<[2], [2], [1], [1], [0, 0, 0, 1, 1, 1], [0], [0]>} : vector<2x8x16xbf16>, vector<2x8x16xbf16>, vector<2x8x8xf32> -> vector<2x8x8xf32>
    "tpu.trace_stop"() : () -> ()
    %cst_75 = arith.constant 2.500000e-01 : f32
    %123 = vector.broadcast %cst_75 : f32 to vector<2x8x8xf32>
    %124 = arith.mulf %122, %123 : vector<2x8x8xf32>
    %125 = arith.addf %124, %17 : vector<2x8x8xf32>
    %cst_76 = arith.constant dense<0xFF800000> : vector<2x8xf32>
    %126 = vector.multi_reduction <maximumf>, %125, %cst_76 [2] : vector<2x8x8xf32> to vector<2x8xf32>
    %127 = vector.shape_cast %126 : vector<2x8xf32> to vector<2x8x1xf32>
    %128 = vector.broadcast %127 : vector<2x8x1xf32> to vector<2x8x8xf32>
    %129 = arith.subf %125, %128 : vector<2x8x8xf32>
    %130 = math.exp %129 : vector<2x8x8xf32>
    %cst_77 = arith.constant dense<0.000000e+00> : vector<2x8xf32>
    %131 = vector.multi_reduction <add>, %130, %cst_77 [2] : vector<2x8x8xf32> to vector<2x8xf32>
    %132 = vector.shape_cast %131 : vector<2x8xf32> to vector<2x8x1xf32>
    %133 = tpu.reciprocal %132 {approx = true} : vector<2x8x1xf32> -> vector<2x8x1xf32>
    %134 = vector.broadcast %133 : vector<2x8x1xf32> to vector<2x8x8xf32>
    %135 = arith.mulf %130, %134 : vector<2x8x8xf32>
    %136 = arith.truncf %135 : vector<2x8x8xf32> to vector<2x8x8xbf16>
    %137 = arith.truncf %119 : vector<2x8x16xf32> to vector<2x8x16xbf16>
    "tpu.trace_start"() <{level = 10 : i32, message = "bqk,bkd->bqd"}> : () -> ()
    %cst_78 = arith.constant dense<0.000000e+00> : vector<2x8x16xf32>
    %138 = tpu.matmul %136, %137, %cst_78 {dimension_numbers = #tpu.dot_dimension_numbers<[2], [1], [1], [2], [0, 0, 0, 1, 1, 2], [0], [0]>} : vector<2x8x8xbf16>, vector<2x8x16xbf16>, vector<2x8x16xf32> -> vector<2x8x16xf32>
    "tpu.trace_stop"() : () -> ()
    %139 = vector.shape_cast %138 : vector<2x8x16xf32> to vector<16x16xf32>
    %140 = arith.truncf %139 : vector<16x16xf32> to vector<16x16xbf16>
    %c0_79 = arith.constant 0 : index
    %c16_80 = arith.constant 16 : index
    %c0_81 = arith.constant 0 : index
    %141 = vector.load %arg13[%c0_79, %c16_80, %c0_81] : memref<2x32x32xbf16, #tpu.memory_space<vmem>>, vector<1x16x32xbf16>
    %142 = vector.shape_cast %141 : vector<1x16x32xbf16> to vector<16x32xbf16>
    %cst_82 = arith.constant dense<0.000000e+00> : vector<16x32xf32>
    %143 = tpu.matmul %140, %142, %cst_82 {dimension_numbers = #tpu.dot_dimension_numbers<[1], [0], [0], [1], [0, 0, 1, 1], [], []>} : vector<16x16xbf16>, vector<16x32xbf16>, vector<16x32xf32> -> vector<16x32xf32>
    %144 = arith.addf %95, %143 : vector<16x32xf32>
    %c0_83 = arith.constant 0 : index
    %c0_84 = arith.constant 0 : index
    %c0_85 = arith.constant 0 : index
    %145 = vector.load %arg14[%c0_83, %c0_84, %c0_85] : memref<2x1x32xf32, #tpu.memory_space<vmem>>, vector<1x1x32xf32>
    %146 = vector.shape_cast %145 : vector<1x1x32xf32> to vector<1x32xf32>
    %147 = vector.broadcast %146 : vector<1x32xf32> to vector<16x32xf32>
    %148 = arith.addf %144, %147 : vector<16x32xf32>
    %149 = vector.shape_cast %148 : vector<16x32xf32> to vector<2x8x32xf32>
    %150 = arith.addf %14, %149 : vector<2x8x32xf32>
    %c0_86 = arith.constant 0 : index
    %c0_87 = arith.constant 0 : index
    %c0_88 = arith.constant 0 : index
    %c0_89 = arith.constant 0 : index
    %151 = vector.load %arg15[%c0_86, %c0_87, %c0_88, %c0_89] : memref<2x1x1x32xf32, #tpu.memory_space<vmem>>, vector<1x1x1x32xf32>
    %152 = vector.shape_cast %151 : vector<1x1x1x32xf32> to vector<1x1x32xf32>
    %c0_90 = arith.constant 0 : index
    %c0_91 = arith.constant 0 : index
    %c0_92 = arith.constant 0 : index
    %c0_93 = arith.constant 0 : index
    %153 = vector.load %arg16[%c0_90, %c0_91, %c0_92, %c0_93] : memref<2x1x1x32xf32, #tpu.memory_space<vmem>>, vector<1x1x1x32xf32>
    %154 = vector.shape_cast %153 : vector<1x1x1x32xf32> to vector<1x1x32xf32>
    %cst_94 = arith.constant dense<0.000000e+00> : vector<2x8xf32>
    %155 = vector.multi_reduction <add>, %150, %cst_94 [2] : vector<2x8x32xf32> to vector<2x8xf32>
    %156 = vector.shape_cast %155 : vector<2x8xf32> to vector<2x8x1xf32>
    %cst_95 = arith.constant 3.200000e+01 : f32
    %157 = vector.broadcast %cst_95 : f32 to vector<2x8x1xf32>
    %158 = arith.divf %156, %157 : vector<2x8x1xf32>
    %159 = vector.broadcast %158 : vector<2x8x1xf32> to vector<2x8x32xf32>
    %160 = arith.subf %150, %159 : vector<2x8x32xf32>
    %161 = arith.mulf %160, %160 : vector<2x8x32xf32>
    %cst_96 = arith.constant dense<0.000000e+00> : vector<2x8xf32>
    %162 = vector.multi_reduction <add>, %161, %cst_96 [2] : vector<2x8x32xf32> to vector<2x8xf32>
    %163 = vector.shape_cast %162 : vector<2x8xf32> to vector<2x8x1xf32>
    %cst_97 = arith.constant 3.200000e+01 : f32
    %164 = vector.broadcast %cst_97 : f32 to vector<2x8x1xf32>
    %165 = arith.divf %163, %164 : vector<2x8x1xf32>
    %166 = vector.broadcast %158 : vector<2x8x1xf32> to vector<2x8x32xf32>
    %167 = arith.subf %150, %166 : vector<2x8x32xf32>
    %cst_98 = arith.constant 9.99999974E-6 : f32
    %168 = vector.broadcast %cst_98 : f32 to vector<2x8x1xf32>
    %169 = arith.addf %165, %168 : vector<2x8x1xf32>
    %170 = math.rsqrt %169 : vector<2x8x1xf32>
    %171 = vector.broadcast %170 : vector<2x8x1xf32> to vector<2x8x32xf32>
    %172 = arith.mulf %167, %171 : vector<2x8x32xf32>
    %173 = vector.broadcast %152 : vector<1x1x32xf32> to vector<2x8x32xf32>
    %174 = arith.mulf %172, %173 : vector<2x8x32xf32>
    %175 = vector.broadcast %154 : vector<1x1x32xf32> to vector<2x8x32xf32>
    %176 = arith.addf %174, %175 : vector<2x8x32xf32>
    %177 = vector.shape_cast %176 : vector<2x8x32xf32> to vector<16x32xf32>
    %178 = arith.truncf %177 : vector<16x32xf32> to vector<16x32xbf16>
    %c0_99 = arith.constant 0 : index
    %c0_100 = arith.constant 0 : index
    %c0_101 = arith.constant 0 : index
    %179 = vector.load %arg17[%c0_99, %c0_100, %c0_101] : memref<2x32x128xbf16, #tpu.memory_space<vmem>>, vector<1x32x128xbf16>
    %180 = vector.shape_cast %179 : vector<1x32x128xbf16> to vector<32x128xbf16>
    %cst_102 = arith.constant dense<0.000000e+00> : vector<16x128xf32>
    %181 = tpu.matmul %178, %180, %cst_102 {dimension_numbers = #tpu.dot_dimension_numbers<[1], [0], [0], [1], [0, 0, 1, 1], [], []>} : vector<16x32xbf16>, vector<32x128xbf16>, vector<16x128xf32> -> vector<16x128xf32>
    %c0_103 = arith.constant 0 : index
    %c0_104 = arith.constant 0 : index
    %c0_105 = arith.constant 0 : index
    %182 = vector.load %arg18[%c0_103, %c0_104, %c0_105] : memref<2x1x128xf32, #tpu.memory_space<vmem>>, vector<1x1x128xf32>
    %183 = vector.shape_cast %182 : vector<1x1x128xf32> to vector<1x128xf32>
    %184 = vector.broadcast %183 : vector<1x128xf32> to vector<16x128xf32>
    %185 = arith.addf %181, %184 : vector<16x128xf32>
    %cst_106 = arith.constant 5.000000e-01 : f32
    %186 = vector.broadcast %cst_106 : f32 to vector<16x128xf32>
    %187 = arith.mulf %186, %185 : vector<16x128xf32>
    %cst_107 = arith.constant 4.471500e-02 : f32
    %188 = vector.broadcast %cst_107 : f32 to vector<16x128xf32>
    %189 = arith.mulf %188, %185 : vector<16x128xf32>
    %190 = arith.mulf %189, %185 : vector<16x128xf32>
    %191 = arith.mulf %190, %185 : vector<16x128xf32>
    %192 = arith.addf %185, %191 : vector<16x128xf32>
    %cst_108 = arith.constant 0.797884583 : f32
    %193 = vector.broadcast %cst_108 : f32 to vector<16x128xf32>
    %194 = arith.mulf %193, %192 : vector<16x128xf32>
    %195 = math.tanh %194 : vector<16x128xf32>
    %cst_109 = arith.constant 1.000000e+00 : f32
    %196 = vector.broadcast %cst_109 : f32 to vector<16x128xf32>
    %197 = arith.addf %196, %195 : vector<16x128xf32>
    %198 = arith.mulf %187, %197 : vector<16x128xf32>
    %199 = arith.truncf %198 : vector<16x128xf32> to vector<16x128xbf16>
    %c0_110 = arith.constant 0 : index
    %c0_111 = arith.constant 0 : index
    %c0_112 = arith.constant 0 : index
    %200 = vector.load %arg19[%c0_110, %c0_111, %c0_112] : memref<2x128x32xbf16, #tpu.memory_space<vmem>>, vector<1x128x32xbf16>
    %201 = vector.shape_cast %200 : vector<1x128x32xbf16> to vector<128x32xbf16>
    %cst_113 = arith.constant dense<0.000000e+00> : vector<16x32xf32>
    %202 = tpu.matmul %199, %201, %cst_113 {dimension_numbers = #tpu.dot_dimension_numbers<[1], [0], [0], [1], [0, 0, 1, 1], [], []>} : vector<16x128xbf16>, vector<128x32xbf16>, vector<16x32xf32> -> vector<16x32xf32>
    %c0_114 = arith.constant 0 : index
    %c0_115 = arith.constant 0 : index
    %c0_116 = arith.constant 0 : index
    %203 = vector.load %arg20[%c0_114, %c0_115, %c0_116] : memref<2x1x32xf32, #tpu.memory_space<vmem>>, vector<1x1x32xf32>
    %204 = vector.shape_cast %203 : vector<1x1x32xf32> to vector<1x32xf32>
    %205 = vector.broadcast %204 : vector<1x32xf32> to vector<16x32xf32>
    %206 = arith.addf %202, %205 : vector<16x32xf32>
    %207 = vector.shape_cast %206 : vector<16x32xf32> to vector<2x8x32xf32>
    %208 = arith.addf %150, %207 : vector<2x8x32xf32>
    %c1 = arith.constant 1 : index
    %c0_117 = arith.constant 0 : index
    %c0_118 = arith.constant 0 : index
    %c0_119 = arith.constant 0 : index
    %209 = vector.load %arg5[%c1, %c0_117, %c0_118, %c0_119] : memref<2x1x1x32xf32, #tpu.memory_space<vmem>>, vector<1x1x1x32xf32>
    %210 = vector.shape_cast %209 : vector<1x1x1x32xf32> to vector<1x1x32xf32>
    %c1_120 = arith.constant 1 : index
    %c0_121 = arith.constant 0 : index
    %c0_122 = arith.constant 0 : index
    %c0_123 = arith.constant 0 : index
    %211 = vector.load %arg6[%c1_120, %c0_121, %c0_122, %c0_123] : memref<2x1x1x32xf32, #tpu.memory_space<vmem>>, vector<1x1x1x32xf32>
    %212 = vector.shape_cast %211 : vector<1x1x1x32xf32> to vector<1x1x32xf32>
    %cst_124 = arith.constant dense<0.000000e+00> : vector<2x8xf32>
    %213 = vector.multi_reduction <add>, %208, %cst_124 [2] : vector<2x8x32xf32> to vector<2x8xf32>
    %214 = vector.shape_cast %213 : vector<2x8xf32> to vector<2x8x1xf32>
    %cst_125 = arith.constant 3.200000e+01 : f32
    %215 = vector.broadcast %cst_125 : f32 to vector<2x8x1xf32>
    %216 = arith.divf %214, %215 : vector<2x8x1xf32>
    %217 = vector.broadcast %216 : vector<2x8x1xf32> to vector<2x8x32xf32>
    %218 = arith.subf %208, %217 : vector<2x8x32xf32>
    %219 = arith.mulf %218, %218 : vector<2x8x32xf32>
    %cst_126 = arith.constant dense<0.000000e+00> : vector<2x8xf32>
    %220 = vector.multi_reduction <add>, %219, %cst_126 [2] : vector<2x8x32xf32> to vector<2x8xf32>
    %221 = vector.shape_cast %220 : vector<2x8xf32> to vector<2x8x1xf32>
    %cst_127 = arith.constant 3.200000e+01 : f32
    %222 = vector.broadcast %cst_127 : f32 to vector<2x8x1xf32>
    %223 = arith.divf %221, %222 : vector<2x8x1xf32>
    %224 = vector.broadcast %216 : vector<2x8x1xf32> to vector<2x8x32xf32>
    %225 = arith.subf %208, %224 : vector<2x8x32xf32>
    %cst_128 = arith.constant 9.99999974E-6 : f32
    %226 = vector.broadcast %cst_128 : f32 to vector<2x8x1xf32>
    %227 = arith.addf %223, %226 : vector<2x8x1xf32>
    %228 = math.rsqrt %227 : vector<2x8x1xf32>
    %229 = vector.broadcast %228 : vector<2x8x1xf32> to vector<2x8x32xf32>
    %230 = arith.mulf %225, %229 : vector<2x8x32xf32>
    %231 = vector.broadcast %210 : vector<1x1x32xf32> to vector<2x8x32xf32>
    %232 = arith.mulf %230, %231 : vector<2x8x32xf32>
    %233 = vector.broadcast %212 : vector<1x1x32xf32> to vector<2x8x32xf32>
    %234 = arith.addf %232, %233 : vector<2x8x32xf32>
    %235 = vector.shape_cast %234 : vector<2x8x32xf32> to vector<16x32xf32>
    %236 = arith.truncf %235 : vector<16x32xf32> to vector<16x32xbf16>
    %cst_129 = arith.constant 0.000000e+00 : f32
    %237 = vector.broadcast %cst_129 : f32 to vector<16x32xf32>
    %c1_130 = arith.constant 1 : index
    %c0_131 = arith.constant 0 : index
    %c0_132 = arith.constant 0 : index
    %238 = vector.load %arg7[%c1_130, %c0_131, %c0_132] : memref<2x32x32xbf16, #tpu.memory_space<vmem>>, vector<1x32x16xbf16>
    %239 = vector.shape_cast %238 : vector<1x32x16xbf16> to vector<32x16xbf16>
    %cst_133 = arith.constant dense<0.000000e+00> : vector<16x16xf32>
    %240 = tpu.matmul %236, %239, %cst_133 {dimension_numbers = #tpu.dot_dimension_numbers<[1], [0], [0], [1], [0, 0, 1, 1], [], []>} : vector<16x32xbf16>, vector<32x16xbf16>, vector<16x16xf32> -> vector<16x16xf32>
    %c1_134 = arith.constant 1 : index
    %c0_135 = arith.constant 0 : index
    %c0_136 = arith.constant 0 : index
    %241 = vector.load %arg10[%c1_134, %c0_135, %c0_136] : memref<2x1x32xf32, #tpu.memory_space<vmem>>, vector<1x1x16xf32>
    %242 = vector.shape_cast %241 : vector<1x1x16xf32> to vector<1x16xf32>
    %243 = vector.broadcast %242 : vector<1x16xf32> to vector<16x16xf32>
    %244 = arith.addf %240, %243 : vector<16x16xf32>
    %245 = vector.shape_cast %244 : vector<16x16xf32> to vector<2x8x16xf32>
    %c1_137 = arith.constant 1 : index
    %c0_138 = arith.constant 0 : index
    %c0_139 = arith.constant 0 : index
    %246 = vector.load %arg8[%c1_137, %c0_138, %c0_139] : memref<2x32x32xbf16, #tpu.memory_space<vmem>>, vector<1x32x16xbf16>
    %247 = vector.shape_cast %246 : vector<1x32x16xbf16> to vector<32x16xbf16>
    %cst_140 = arith.constant dense<0.000000e+00> : vector<16x16xf32>
    %248 = tpu.matmul %236, %247, %cst_140 {dimension_numbers = #tpu.dot_dimension_numbers<[1], [0], [0], [1], [0, 0, 1, 1], [], []>} : vector<16x32xbf16>, vector<32x16xbf16>, vector<16x16xf32> -> vector<16x16xf32>
    %c1_141 = arith.constant 1 : index
    %c0_142 = arith.constant 0 : index
    %c0_143 = arith.constant 0 : index
    %249 = vector.load %arg11[%c1_141, %c0_142, %c0_143] : memref<2x1x32xf32, #tpu.memory_space<vmem>>, vector<1x1x16xf32>
    %250 = vector.shape_cast %249 : vector<1x1x16xf32> to vector<1x16xf32>
    %251 = vector.broadcast %250 : vector<1x16xf32> to vector<16x16xf32>
    %252 = arith.addf %248, %251 : vector<16x16xf32>
    %253 = vector.shape_cast %252 : vector<16x16xf32> to vector<2x8x16xf32>
    %c1_144 = arith.constant 1 : index
    %c0_145 = arith.constant 0 : index
    %c0_146 = arith.constant 0 : index
    %254 = vector.load %arg9[%c1_144, %c0_145, %c0_146] : memref<2x32x32xbf16, #tpu.memory_space<vmem>>, vector<1x32x16xbf16>
    %255 = vector.shape_cast %254 : vector<1x32x16xbf16> to vector<32x16xbf16>
    %cst_147 = arith.constant dense<0.000000e+00> : vector<16x16xf32>
    %256 = tpu.matmul %236, %255, %cst_147 {dimension_numbers = #tpu.dot_dimension_numbers<[1], [0], [0], [1], [0, 0, 1, 1], [], []>} : vector<16x32xbf16>, vector<32x16xbf16>, vector<16x16xf32> -> vector<16x16xf32>
    %c1_148 = arith.constant 1 : index
    %c0_149 = arith.constant 0 : index
    %c0_150 = arith.constant 0 : index
    %257 = vector.load %arg12[%c1_148, %c0_149, %c0_150] : memref<2x1x32xf32, #tpu.memory_space<vmem>>, vector<1x1x16xf32>
    %258 = vector.shape_cast %257 : vector<1x1x16xf32> to vector<1x16xf32>
    %259 = vector.broadcast %258 : vector<1x16xf32> to vector<16x16xf32>
    %260 = arith.addf %256, %259 : vector<16x16xf32>
    %261 = vector.shape_cast %260 : vector<16x16xf32> to vector<2x8x16xf32>
    %262 = arith.truncf %245 : vector<2x8x16xf32> to vector<2x8x16xbf16>
    %263 = arith.truncf %253 : vector<2x8x16xf32> to vector<2x8x16xbf16>
    "tpu.trace_start"() <{level = 10 : i32, message = "bqd,bkd->bqk"}> : () -> ()
    %cst_151 = arith.constant dense<0.000000e+00> : vector<2x8x8xf32>
    %264 = tpu.matmul %262, %263, %cst_151 {dimension_numbers = #tpu.dot_dimension_numbers<[2], [2], [1], [1], [0, 0, 0, 1, 1, 1], [0], [0]>} : vector<2x8x16xbf16>, vector<2x8x16xbf16>, vector<2x8x8xf32> -> vector<2x8x8xf32>
    "tpu.trace_stop"() : () -> ()
    %cst_152 = arith.constant 2.500000e-01 : f32
    %265 = vector.broadcast %cst_152 : f32 to vector<2x8x8xf32>
    %266 = arith.mulf %264, %265 : vector<2x8x8xf32>
    %267 = arith.addf %266, %17 : vector<2x8x8xf32>
    %cst_153 = arith.constant dense<0xFF800000> : vector<2x8xf32>
    %268 = vector.multi_reduction <maximumf>, %267, %cst_153 [2] : vector<2x8x8xf32> to vector<2x8xf32>
    %269 = vector.shape_cast %268 : vector<2x8xf32> to vector<2x8x1xf32>
    %270 = vector.broadcast %269 : vector<2x8x1xf32> to vector<2x8x8xf32>
    %271 = arith.subf %267, %270 : vector<2x8x8xf32>
    %272 = math.exp %271 : vector<2x8x8xf32>
    %cst_154 = arith.constant dense<0.000000e+00> : vector<2x8xf32>
    %273 = vector.multi_reduction <add>, %272, %cst_154 [2] : vector<2x8x8xf32> to vector<2x8xf32>
    %274 = vector.shape_cast %273 : vector<2x8xf32> to vector<2x8x1xf32>
    %275 = tpu.reciprocal %274 {approx = true} : vector<2x8x1xf32> -> vector<2x8x1xf32>
    %276 = vector.broadcast %275 : vector<2x8x1xf32> to vector<2x8x8xf32>
    %277 = arith.mulf %272, %276 : vector<2x8x8xf32>
    %278 = arith.truncf %277 : vector<2x8x8xf32> to vector<2x8x8xbf16>
    %279 = arith.truncf %261 : vector<2x8x16xf32> to vector<2x8x16xbf16>
    "tpu.trace_start"() <{level = 10 : i32, message = "bqk,bkd->bqd"}> : () -> ()
    %cst_155 = arith.constant dense<0.000000e+00> : vector<2x8x16xf32>
    %280 = tpu.matmul %278, %279, %cst_155 {dimension_numbers = #tpu.dot_dimension_numbers<[2], [1], [1], [2], [0, 0, 0, 1, 1, 2], [0], [0]>} : vector<2x8x8xbf16>, vector<2x8x16xbf16>, vector<2x8x16xf32> -> vector<2x8x16xf32>
    "tpu.trace_stop"() : () -> ()
    %281 = vector.shape_cast %280 : vector<2x8x16xf32> to vector<16x16xf32>
    %282 = arith.truncf %281 : vector<16x16xf32> to vector<16x16xbf16>
    %c1_156 = arith.constant 1 : index
    %c0_157 = arith.constant 0 : index
    %c0_158 = arith.constant 0 : index
    %283 = vector.load %arg13[%c1_156, %c0_157, %c0_158] : memref<2x32x32xbf16, #tpu.memory_space<vmem>>, vector<1x16x32xbf16>
    %284 = vector.shape_cast %283 : vector<1x16x32xbf16> to vector<16x32xbf16>
    %cst_159 = arith.constant dense<0.000000e+00> : vector<16x32xf32>
    %285 = tpu.matmul %282, %284, %cst_159 {dimension_numbers = #tpu.dot_dimension_numbers<[1], [0], [0], [1], [0, 0, 1, 1], [], []>} : vector<16x16xbf16>, vector<16x32xbf16>, vector<16x32xf32> -> vector<16x32xf32>
    %286 = arith.addf %237, %285 : vector<16x32xf32>
    %c1_160 = arith.constant 1 : index
    %c0_161 = arith.constant 0 : index
    %c16_162 = arith.constant 16 : index
    %287 = vector.load %arg7[%c1_160, %c0_161, %c16_162] : memref<2x32x32xbf16, #tpu.memory_space<vmem>>, vector<1x32x16xbf16>
    %288 = vector.shape_cast %287 : vector<1x32x16xbf16> to vector<32x16xbf16>
    %cst_163 = arith.constant dense<0.000000e+00> : vector<16x16xf32>
    %289 = tpu.matmul %236, %288, %cst_163 {dimension_numbers = #tpu.dot_dimension_numbers<[1], [0], [0], [1], [0, 0, 1, 1], [], []>} : vector<16x32xbf16>, vector<32x16xbf16>, vector<16x16xf32> -> vector<16x16xf32>
    %c1_164 = arith.constant 1 : index
    %c0_165 = arith.constant 0 : index
    %c16_166 = arith.constant 16 : index
    %290 = vector.load %arg10[%c1_164, %c0_165, %c16_166] : memref<2x1x32xf32, #tpu.memory_space<vmem>>, vector<1x1x16xf32>
    %291 = vector.shape_cast %290 : vector<1x1x16xf32> to vector<1x16xf32>
    %292 = vector.broadcast %291 : vector<1x16xf32> to vector<16x16xf32>
    %293 = arith.addf %289, %292 : vector<16x16xf32>
    %294 = vector.shape_cast %293 : vector<16x16xf32> to vector<2x8x16xf32>
    %c1_167 = arith.constant 1 : index
    %c0_168 = arith.constant 0 : index
    %c16_169 = arith.constant 16 : index
    %295 = vector.load %arg8[%c1_167, %c0_168, %c16_169] : memref<2x32x32xbf16, #tpu.memory_space<vmem>>, vector<1x32x16xbf16>
    %296 = vector.shape_cast %295 : vector<1x32x16xbf16> to vector<32x16xbf16>
    %cst_170 = arith.constant dense<0.000000e+00> : vector<16x16xf32>
    %297 = tpu.matmul %236, %296, %cst_170 {dimension_numbers = #tpu.dot_dimension_numbers<[1], [0], [0], [1], [0, 0, 1, 1], [], []>} : vector<16x32xbf16>, vector<32x16xbf16>, vector<16x16xf32> -> vector<16x16xf32>
    %c1_171 = arith.constant 1 : index
    %c0_172 = arith.constant 0 : index
    %c16_173 = arith.constant 16 : index
    %298 = vector.load %arg11[%c1_171, %c0_172, %c16_173] : memref<2x1x32xf32, #tpu.memory_space<vmem>>, vector<1x1x16xf32>
    %299 = vector.shape_cast %298 : vector<1x1x16xf32> to vector<1x16xf32>
    %300 = vector.broadcast %299 : vector<1x16xf32> to vector<16x16xf32>
    %301 = arith.addf %297, %300 : vector<16x16xf32>
    %302 = vector.shape_cast %301 : vector<16x16xf32> to vector<2x8x16xf32>
    %c1_174 = arith.constant 1 : index
    %c0_175 = arith.constant 0 : index
    %c16_176 = arith.constant 16 : index
    %303 = vector.load %arg9[%c1_174, %c0_175, %c16_176] : memref<2x32x32xbf16, #tpu.memory_space<vmem>>, vector<1x32x16xbf16>
    %304 = vector.shape_cast %303 : vector<1x32x16xbf16> to vector<32x16xbf16>
    %cst_177 = arith.constant dense<0.000000e+00> : vector<16x16xf32>
    %305 = tpu.matmul %236, %304, %cst_177 {dimension_numbers = #tpu.dot_dimension_numbers<[1], [0], [0], [1], [0, 0, 1, 1], [], []>} : vector<16x32xbf16>, vector<32x16xbf16>, vector<16x16xf32> -> vector<16x16xf32>
    %c1_178 = arith.constant 1 : index
    %c0_179 = arith.constant 0 : index
    %c16_180 = arith.constant 16 : index
    %306 = vector.load %arg12[%c1_178, %c0_179, %c16_180] : memref<2x1x32xf32, #tpu.memory_space<vmem>>, vector<1x1x16xf32>
    %307 = vector.shape_cast %306 : vector<1x1x16xf32> to vector<1x16xf32>
    %308 = vector.broadcast %307 : vector<1x16xf32> to vector<16x16xf32>
    %309 = arith.addf %305, %308 : vector<16x16xf32>
    %310 = vector.shape_cast %309 : vector<16x16xf32> to vector<2x8x16xf32>
    %311 = arith.truncf %294 : vector<2x8x16xf32> to vector<2x8x16xbf16>
    %312 = arith.truncf %302 : vector<2x8x16xf32> to vector<2x8x16xbf16>
    "tpu.trace_start"() <{level = 10 : i32, message = "bqd,bkd->bqk"}> : () -> ()
    %cst_181 = arith.constant dense<0.000000e+00> : vector<2x8x8xf32>
    %313 = tpu.matmul %311, %312, %cst_181 {dimension_numbers = #tpu.dot_dimension_numbers<[2], [2], [1], [1], [0, 0, 0, 1, 1, 1], [0], [0]>} : vector<2x8x16xbf16>, vector<2x8x16xbf16>, vector<2x8x8xf32> -> vector<2x8x8xf32>
    "tpu.trace_stop"() : () -> ()
    %cst_182 = arith.constant 2.500000e-01 : f32
    %314 = vector.broadcast %cst_182 : f32 to vector<2x8x8xf32>
    %315 = arith.mulf %313, %314 : vector<2x8x8xf32>
    %316 = arith.addf %315, %17 : vector<2x8x8xf32>
    %cst_183 = arith.constant dense<0xFF800000> : vector<2x8xf32>
    %317 = vector.multi_reduction <maximumf>, %316, %cst_183 [2] : vector<2x8x8xf32> to vector<2x8xf32>
    %318 = vector.shape_cast %317 : vector<2x8xf32> to vector<2x8x1xf32>
    %319 = vector.broadcast %318 : vector<2x8x1xf32> to vector<2x8x8xf32>
    %320 = arith.subf %316, %319 : vector<2x8x8xf32>
    %321 = math.exp %320 : vector<2x8x8xf32>
    %cst_184 = arith.constant dense<0.000000e+00> : vector<2x8xf32>
    %322 = vector.multi_reduction <add>, %321, %cst_184 [2] : vector<2x8x8xf32> to vector<2x8xf32>
    %323 = vector.shape_cast %322 : vector<2x8xf32> to vector<2x8x1xf32>
    %324 = tpu.reciprocal %323 {approx = true} : vector<2x8x1xf32> -> vector<2x8x1xf32>
    %325 = vector.broadcast %324 : vector<2x8x1xf32> to vector<2x8x8xf32>
    %326 = arith.mulf %321, %325 : vector<2x8x8xf32>
    %327 = arith.truncf %326 : vector<2x8x8xf32> to vector<2x8x8xbf16>
    %328 = arith.truncf %310 : vector<2x8x16xf32> to vector<2x8x16xbf16>
    "tpu.trace_start"() <{level = 10 : i32, message = "bqk,bkd->bqd"}> : () -> ()
    %cst_185 = arith.constant dense<0.000000e+00> : vector<2x8x16xf32>
    %329 = tpu.matmul %327, %328, %cst_185 {dimension_numbers = #tpu.dot_dimension_numbers<[2], [1], [1], [2], [0, 0, 0, 1, 1, 2], [0], [0]>} : vector<2x8x8xbf16>, vector<2x8x16xbf16>, vector<2x8x16xf32> -> vector<2x8x16xf32>
    "tpu.trace_stop"() : () -> ()
    %330 = vector.shape_cast %329 : vector<2x8x16xf32> to vector<16x16xf32>
    %331 = arith.truncf %330 : vector<16x16xf32> to vector<16x16xbf16>
    %c1_186 = arith.constant 1 : index
    %c16_187 = arith.constant 16 : index
    %c0_188 = arith.constant 0 : index
    %332 = vector.load %arg13[%c1_186, %c16_187, %c0_188] : memref<2x32x32xbf16, #tpu.memory_space<vmem>>, vector<1x16x32xbf16>
    %333 = vector.shape_cast %332 : vector<1x16x32xbf16> to vector<16x32xbf16>
    %cst_189 = arith.constant dense<0.000000e+00> : vector<16x32xf32>
    %334 = tpu.matmul %331, %333, %cst_189 {dimension_numbers = #tpu.dot_dimension_numbers<[1], [0], [0], [1], [0, 0, 1, 1], [], []>} : vector<16x16xbf16>, vector<16x32xbf16>, vector<16x32xf32> -> vector<16x32xf32>
    %335 = arith.addf %286, %334 : vector<16x32xf32>
    %c1_190 = arith.constant 1 : index
    %c0_191 = arith.constant 0 : index
    %c0_192 = arith.constant 0 : index
    %336 = vector.load %arg14[%c1_190, %c0_191, %c0_192] : memref<2x1x32xf32, #tpu.memory_space<vmem>>, vector<1x1x32xf32>
    %337 = vector.shape_cast %336 : vector<1x1x32xf32> to vector<1x32xf32>
    %338 = vector.broadcast %337 : vector<1x32xf32> to vector<16x32xf32>
    %339 = arith.addf %335, %338 : vector<16x32xf32>
    %340 = vector.shape_cast %339 : vector<16x32xf32> to vector<2x8x32xf32>
    %341 = arith.addf %208, %340 : vector<2x8x32xf32>
    %c1_193 = arith.constant 1 : index
    %c0_194 = arith.constant 0 : index
    %c0_195 = arith.constant 0 : index
    %c0_196 = arith.constant 0 : index
    %342 = vector.load %arg15[%c1_193, %c0_194, %c0_195, %c0_196] : memref<2x1x1x32xf32, #tpu.memory_space<vmem>>, vector<1x1x1x32xf32>
    %343 = vector.shape_cast %342 : vector<1x1x1x32xf32> to vector<1x1x32xf32>
    %c1_197 = arith.constant 1 : index
    %c0_198 = arith.constant 0 : index
    %c0_199 = arith.constant 0 : index
    %c0_200 = arith.constant 0 : index
    %344 = vector.load %arg16[%c1_197, %c0_198, %c0_199, %c0_200] : memref<2x1x1x32xf32, #tpu.memory_space<vmem>>, vector<1x1x1x32xf32>
    %345 = vector.shape_cast %344 : vector<1x1x1x32xf32> to vector<1x1x32xf32>
    %cst_201 = arith.constant dense<0.000000e+00> : vector<2x8xf32>
    %346 = vector.multi_reduction <add>, %341, %cst_201 [2] : vector<2x8x32xf32> to vector<2x8xf32>
    %347 = vector.shape_cast %346 : vector<2x8xf32> to vector<2x8x1xf32>
    %cst_202 = arith.constant 3.200000e+01 : f32
    %348 = vector.broadcast %cst_202 : f32 to vector<2x8x1xf32>
    %349 = arith.divf %347, %348 : vector<2x8x1xf32>
    %350 = vector.broadcast %349 : vector<2x8x1xf32> to vector<2x8x32xf32>
    %351 = arith.subf %341, %350 : vector<2x8x32xf32>
    %352 = arith.mulf %351, %351 : vector<2x8x32xf32>
    %cst_203 = arith.constant dense<0.000000e+00> : vector<2x8xf32>
    %353 = vector.multi_reduction <add>, %352, %cst_203 [2] : vector<2x8x32xf32> to vector<2x8xf32>
    %354 = vector.shape_cast %353 : vector<2x8xf32> to vector<2x8x1xf32>
    %cst_204 = arith.constant 3.200000e+01 : f32
    %355 = vector.broadcast %cst_204 : f32 to vector<2x8x1xf32>
    %356 = arith.divf %354, %355 : vector<2x8x1xf32>
    %357 = vector.broadcast %349 : vector<2x8x1xf32> to vector<2x8x32xf32>
    %358 = arith.subf %341, %357 : vector<2x8x32xf32>
    %cst_205 = arith.constant 9.99999974E-6 : f32
    %359 = vector.broadcast %cst_205 : f32 to vector<2x8x1xf32>
    %360 = arith.addf %356, %359 : vector<2x8x1xf32>
    %361 = math.rsqrt %360 : vector<2x8x1xf32>
    %362 = vector.broadcast %361 : vector<2x8x1xf32> to vector<2x8x32xf32>
    %363 = arith.mulf %358, %362 : vector<2x8x32xf32>
    %364 = vector.broadcast %343 : vector<1x1x32xf32> to vector<2x8x32xf32>
    %365 = arith.mulf %363, %364 : vector<2x8x32xf32>
    %366 = vector.broadcast %345 : vector<1x1x32xf32> to vector<2x8x32xf32>
    %367 = arith.addf %365, %366 : vector<2x8x32xf32>
    %368 = vector.shape_cast %367 : vector<2x8x32xf32> to vector<16x32xf32>
    %369 = arith.truncf %368 : vector<16x32xf32> to vector<16x32xbf16>
    %c1_206 = arith.constant 1 : index
    %c0_207 = arith.constant 0 : index
    %c0_208 = arith.constant 0 : index
    %370 = vector.load %arg17[%c1_206, %c0_207, %c0_208] : memref<2x32x128xbf16, #tpu.memory_space<vmem>>, vector<1x32x128xbf16>
    %371 = vector.shape_cast %370 : vector<1x32x128xbf16> to vector<32x128xbf16>
    %cst_209 = arith.constant dense<0.000000e+00> : vector<16x128xf32>
    %372 = tpu.matmul %369, %371, %cst_209 {dimension_numbers = #tpu.dot_dimension_numbers<[1], [0], [0], [1], [0, 0, 1, 1], [], []>} : vector<16x32xbf16>, vector<32x128xbf16>, vector<16x128xf32> -> vector<16x128xf32>
    %c1_210 = arith.constant 1 : index
    %c0_211 = arith.constant 0 : index
    %c0_212 = arith.constant 0 : index
    %373 = vector.load %arg18[%c1_210, %c0_211, %c0_212] : memref<2x1x128xf32, #tpu.memory_space<vmem>>, vector<1x1x128xf32>
    %374 = vector.shape_cast %373 : vector<1x1x128xf32> to vector<1x128xf32>
    %375 = vector.broadcast %374 : vector<1x128xf32> to vector<16x128xf32>
    %376 = arith.addf %372, %375 : vector<16x128xf32>
    %cst_213 = arith.constant 5.000000e-01 : f32
    %377 = vector.broadcast %cst_213 : f32 to vector<16x128xf32>
    %378 = arith.mulf %377, %376 : vector<16x128xf32>
    %cst_214 = arith.constant 4.471500e-02 : f32
    %379 = vector.broadcast %cst_214 : f32 to vector<16x128xf32>
    %380 = arith.mulf %379, %376 : vector<16x128xf32>
    %381 = arith.mulf %380, %376 : vector<16x128xf32>
    %382 = arith.mulf %381, %376 : vector<16x128xf32>
    %383 = arith.addf %376, %382 : vector<16x128xf32>
    %cst_215 = arith.constant 0.797884583 : f32
    %384 = vector.broadcast %cst_215 : f32 to vector<16x128xf32>
    %385 = arith.mulf %384, %383 : vector<16x128xf32>
    %386 = math.tanh %385 : vector<16x128xf32>
    %cst_216 = arith.constant 1.000000e+00 : f32
    %387 = vector.broadcast %cst_216 : f32 to vector<16x128xf32>
    %388 = arith.addf %387, %386 : vector<16x128xf32>
    %389 = arith.mulf %378, %388 : vector<16x128xf32>
    %390 = arith.truncf %389 : vector<16x128xf32> to vector<16x128xbf16>
    %c1_217 = arith.constant 1 : index
    %c0_218 = arith.constant 0 : index
    %c0_219 = arith.constant 0 : index
    %391 = vector.load %arg19[%c1_217, %c0_218, %c0_219] : memref<2x128x32xbf16, #tpu.memory_space<vmem>>, vector<1x128x32xbf16>
    %392 = vector.shape_cast %391 : vector<1x128x32xbf16> to vector<128x32xbf16>
    %cst_220 = arith.constant dense<0.000000e+00> : vector<16x32xf32>
    %393 = tpu.matmul %390, %392, %cst_220 {dimension_numbers = #tpu.dot_dimension_numbers<[1], [0], [0], [1], [0, 0, 1, 1], [], []>} : vector<16x128xbf16>, vector<128x32xbf16>, vector<16x32xf32> -> vector<16x32xf32>
    %c1_221 = arith.constant 1 : index
    %c0_222 = arith.constant 0 : index
    %c0_223 = arith.constant 0 : index
    %394 = vector.load %arg20[%c1_221, %c0_222, %c0_223] : memref<2x1x32xf32, #tpu.memory_space<vmem>>, vector<1x1x32xf32>
    %395 = vector.shape_cast %394 : vector<1x1x32xf32> to vector<1x32xf32>
    %396 = vector.broadcast %395 : vector<1x32xf32> to vector<16x32xf32>
    %397 = arith.addf %393, %396 : vector<16x32xf32>
    %398 = vector.shape_cast %397 : vector<16x32xf32> to vector<2x8x32xf32>
    %399 = arith.addf %341, %398 : vector<2x8x32xf32>
    %c0_224 = arith.constant 0 : index
    %c0_225 = arith.constant 0 : index
    %c0_226 = arith.constant 0 : index
    %400 = vector.load %arg21[%c0_224, %c0_225, %c0_226] : memref<1x1x32xf32, #tpu.memory_space<vmem>>, vector<1x1x32xf32>
    %c0_227 = arith.constant 0 : index
    %c0_228 = arith.constant 0 : index
    %c0_229 = arith.constant 0 : index
    %401 = vector.load %arg22[%c0_227, %c0_228, %c0_229] : memref<1x1x32xf32, #tpu.memory_space<vmem>>, vector<1x1x32xf32>
    %cst_230 = arith.constant dense<0.000000e+00> : vector<2x8xf32>
    %402 = vector.multi_reduction <add>, %399, %cst_230 [2] : vector<2x8x32xf32> to vector<2x8xf32>
    %403 = vector.shape_cast %402 : vector<2x8xf32> to vector<2x8x1xf32>
    %cst_231 = arith.constant 3.200000e+01 : f32
    %404 = vector.broadcast %cst_231 : f32 to vector<2x8x1xf32>
    %405 = arith.divf %403, %404 : vector<2x8x1xf32>
    %406 = vector.broadcast %405 : vector<2x8x1xf32> to vector<2x8x32xf32>
    %407 = arith.subf %399, %406 : vector<2x8x32xf32>
    %408 = arith.mulf %407, %407 : vector<2x8x32xf32>
    %cst_232 = arith.constant dense<0.000000e+00> : vector<2x8xf32>
    %409 = vector.multi_reduction <add>, %408, %cst_232 [2] : vector<2x8x32xf32> to vector<2x8xf32>
    %410 = vector.shape_cast %409 : vector<2x8xf32> to vector<2x8x1xf32>
    %cst_233 = arith.constant 3.200000e+01 : f32
    %411 = vector.broadcast %cst_233 : f32 to vector<2x8x1xf32>
    %412 = arith.divf %410, %411 : vector<2x8x1xf32>
    %413 = vector.broadcast %405 : vector<2x8x1xf32> to vector<2x8x32xf32>
    %414 = arith.subf %399, %413 : vector<2x8x32xf32>
    %cst_234 = arith.constant 9.99999974E-6 : f32
    %415 = vector.broadcast %cst_234 : f32 to vector<2x8x1xf32>
    %416 = arith.addf %412, %415 : vector<2x8x1xf32>
    %417 = math.rsqrt %416 : vector<2x8x1xf32>
    %418 = vector.broadcast %417 : vector<2x8x1xf32> to vector<2x8x32xf32>
    %419 = arith.mulf %414, %418 : vector<2x8x32xf32>
    %420 = vector.broadcast %400 : vector<1x1x32xf32> to vector<2x8x32xf32>
    %421 = arith.mulf %419, %420 : vector<2x8x32xf32>
    %422 = vector.broadcast %401 : vector<1x1x32xf32> to vector<2x8x32xf32>
    %423 = arith.addf %421, %422 : vector<2x8x32xf32>
    %424 = vector.shape_cast %423 : vector<2x8x32xf32> to vector<16x32xf32>
    %425 = arith.truncf %424 : vector<16x32xf32> to vector<16x32xbf16>
    %c0_235 = arith.constant 0 : index
    %c0_236 = arith.constant 0 : index
    %426 = vector.load %arg3[%c0_235, %c0_236] : memref<32x128xbf16, #tpu.memory_space<vmem>>, vector<32x128xbf16>
    %cst_237 = arith.constant dense<0.000000e+00> : vector<16x128xf32>
    %427 = tpu.matmul %425, %426, %cst_237 {dimension_numbers = #tpu.dot_dimension_numbers<[1], [0], [0], [1], [0, 0, 1, 1], [], []>} : vector<16x32xbf16>, vector<32x128xbf16>, vector<16x128xf32> -> vector<16x128xf32>
    %428 = vector.shape_cast %427 : vector<16x128xf32> to vector<2x8x128xf32>
    %c0_238 = arith.constant 0 : index
    %c0_239 = arith.constant 0 : index
    %c0_240 = arith.constant 0 : index
    %429 = vector.load %arg23[%c0_238, %c0_239, %c0_240] : memref<2x8x128xf32, #tpu.memory_space<vmem>>, vector<2x8x128xf32>
    tpu.vector_store %arg23[%c0_238, %c0_239, %c0_240], %428 {strides = array<i32>} : memref<2x8x128xf32, #tpu.memory_space<vmem>>, vector<2x8x128xf32>,
    return
  }
}

</mosaic_0001>

<bundles_post_ra>
// kernel: gpt_forward.1
= control target key start
LH: loop header
LB: loop body
LE: loop exit
PB: predicated region body
PF: predicated region fallthrough
CT: control target
= control target key end

     0   :  { %s2947_s0 = inlined_call_operand.vmem [shape: s32[16,1], index: 0, kind: input, shape index: {}]   ;;  %s2948_s1 = inlined_call_operand.vmem [shape: f32[2,1,8], index: 1, kind: input, shape index: {}]   ;;  %s2949_s2 = inlined_call_operand.vmem [shape: bf16[128,32], index: 2, kind: input, shape index: {}]   ;;  %s2950_s3 = inlined_call_operand.vmem [shape: bf16[32,128], index: 3, kind: input, shape index: {}]   ;;  %s2951_s4 = inlined_call_operand.vmem [shape: f32[16,32], index: 4, kind: input, shape index: {}]   ;;  %s2952_s5 = inlined_call_operand.vmem [shape: f32[2,1,1,32], index: 5, kind: input, shape index: {}]   ;;  %s2953_s6 = inlined_call_operand.vmem [shape: f32[2,1,1,32], index: 6, kind: input, shape index: {}]   ;;  %s2954_s7 = inlined_call_operand.vmem [shape: bf16[2,32,32], index: 7, kind: input, shape index: {}]   ;;  %s2955_s8 = inlined_call_operand.vmem [shape: bf16[2,32,32], index: 8, kind: input, shape index: {}]   ;;  %s2956_s9 = inlined_call_operand.vmem [shape: bf16[2,32,32], index: 9, kind: input, shape index: {}]   ;;  %s2957_s10 = inlined_call_operand.vmem [shape: f32[2,1,32], index: 10, kind: input, shape index: {}]   ;;  %s2958_s11 = inlined_call_operand.vmem [shape: f32[2,1,32], index: 11, kind: input, shape index: {}]   ;;  %s2959_s12 = inlined_call_operand.vmem [shape: f32[2,1,32], index: 12, kind: input, shape index: {}]   ;;  %s2960_s13 = inlined_call_operand.vmem [shape: bf16[2,32,32], index: 13, kind: input, shape index: {}]   ;;  %s2961_s14 = inlined_call_operand.vmem [shape: f32[2,1,32], index: 14, kind: input, shape index: {}]   ;;  %s2962_s15 = inlined_call_operand.vmem [shape: f32[2,1,1,32], index: 15, kind: input, shape index: {}]   ;;  %s2963_s16 = inlined_call_operand.vmem [shape: f32[2,1,1,32], index: 16, kind: input, shape index: {}]   ;;  %s2964_s17 = inlined_call_operand.vmem [shape: bf16[2,32,128], index: 17, kind: input, shape index: {}]   ;;  %s2965_s18 = inlined_call_operand.vmem [shape: f32[2,1,128], index: 18, kind: input, shape index: {}]   ;;  %s2966_s19 = inlined_call_operand.vmem [shape: bf16[2,128,32], index: 19, kind: input, shape index: {}]   ;;  %s2967_s20 = inlined_call_operand.vmem [shape: f32[2,1,32], index: 20, kind: input, shape index: {}]   ;;  %s2968_s21 = inlined_call_operand.vmem [shape: f32[1,1,32], index: 21, kind: input, shape index: {}]   ;;  %s2969_s22 = inlined_call_operand.vmem [shape: f32[1,1,32], index: 22, kind: input, shape index: {}]   ;;  %s2970_s23 = inlined_call_operand.hbm [shape: f32[2,8,128], index: 23, kind: output, shape index: {}]  }
   0x1   :  { %2979 = sst [smem:[#allocation5_spill]] %s2947_s0 }
   0x2   :  { %2980 = sst [smem:[#allocation6_spill]] %s2948_s1 }
   0x3   :  { %2981 = sst [smem:[#allocation7_spill]] %s2949_s2 }
   0x4   :  { %2982 = sst [smem:[#allocation8_spill]] %s2950_s3 }
   0x5   :  { %2983 = sst [smem:[#allocation9_spill]] %s2951_s4 }
   0x6   :  { %2984 = sst [smem:[#allocation10_spill]] %s2952_s5 }
   0x7   :  { %2985 = sst [smem:[#allocation11_spill]] %s2953_s6 }
   0x8   :  { %2986 = sst [smem:[#allocation12_spill]] %s2954_s7 }
   0x9   :  { %2987 = sst [smem:[#allocation13_spill]] %s2965_s18 }
   0xa   :  { %s2988_s24 = sld [smem:[#allocation5_spill]]  ;;  %v2349_v2 = vmov 0  }
   0xb   :  { %s2989_s18 = sld [smem:[#allocation7_spill]]  ;;  %2230 = vset.pattern.permute.xlu0 %v2349_v2 }
  0x10   :  { %v76_v0 = vld [vmem:[%s2988_s24] sm:$0xff]  ;;  %v77_v5 = vld [vmem:[%s2988_s24 + $0x8] sm:$0xff] }
  0x11   :  { %v2172_v1 = vld [vmem:[%s2989_s18 + $0x38] sm:$0xff]  ;;  %81 = vperm.xlu0 %2230, %v76_v0   ;;  %v2171_v3 = vld [vmem:[%s2989_s18 + $0x30] sm:$0xff]  ;;  %v2170_v4 = vld [vmem:[%s2989_s18 + $0x28] sm:$0xff] }
  0x12   :  { %155 = vmatpush.bf16.msra.mxu0 %v2172_v1  ;;  %v2169_v6 = vld [vmem:[%s2989_s18 + $0x20] sm:$0xff] }
  0x16   :  { %156 = vmatpush.bf16.msra.mxu0 %v2171_v3 }
  0x19   :  { %84 = vperm.xlu0 %2230, %v77_v5  }
  0x1a   :  { %157 = vmatpush.bf16.msra.mxu0 %v2170_v4 }
  0x1b   :  { %28 = vsyncpa [#allocation3], 0  ;;  %v2168_v7 = vld [vmem:[%s2989_s18 + $0x18] sm:$0xff]  ;;  %v2167_v8 = vld [vmem:[%s2989_s18 + $0x10] sm:$0xff]  ;;  %v78_v12 = vlaneseq  ;;  %v2350_v15 = vmov 1.0|1.0  }
  0x1c   :  { %v2166_v9 = vld [vmem:[%s2989_s18 + $0x8] sm:$0xff]  ;;  %v2165_v10 = vld [vmem:[%s2989_s18] sm:$0xff]  ;;  %s2990_s6 = sld [smem:[#allocation9_spill]]  ;;  %vm182_vm3 = vcmask 261120   ;;  %v2351_v23 = vmov 32.0   ;;  %vm354_vm11 = vcmask 130048  }
  0x1d   :  { %v79_v13 = vand.u32 127, %v78_v12  ;;  %2261 = vrcp.f32 %v2351_v23  ;;  %s2991_s7 = sld [smem:[#allocation12_spill]]  ;;  %v2176_v41 = vld [vmem:[%s2955_s8 + $0x8] sm:$0xff]  ;;  %v2175_v46 = vld [vmem:[%s2955_s8] sm:$0xff]  ;;  %vm427_vm12 = vcmask 1043456   ;;  %vm397_vm13 = vcmask 64512  }
  0x1e   :  { %158 = vmatpush.bf16.msra.mxu0 %v2169_v6  ;;  %v2178_v42 = vld [vmem:[%s2956_s9 + $0x8] sm:$0xff]  ;;  %308 = vmatpush.bf16.msra.mxu2 %v2176_v41  ;;  %v2177_v47 = vld [vmem:[%s2956_s9] sm:$0xff]  ;;  %s2992_s4 = sld [smem:[#allocation10_spill]] }
  0x1f   :  { %342 = vmatpush.bf16.msra.mxu3 %v2178_v42  ;;  %v2183_v50 = vld [vmem:[%s2955_s8 + $0x8] sm:$0xff]  ;;  %s2993_s25 = sld [smem:[#allocation11_spill]] }
  0x20   :  { %s2994_s3 = sld [smem:[#allocation6_spill]] }
  0x21   :  { %s2995_s29 = sld [smem:[#allocation13_spill]] }
  0x22   :  { %159 = vmatpush.bf16.msra.mxu0 %v2168_v7  ;;  %v169_v16 = vld [vmem:[%s2990_s6] sm:$0xff]  ;;  %309 = vmatpush.bf16.msra.mxu2 %v2175_v46  ;;  %s2352_s6 = smov 112  }
  0x23   :  { %v2262_v24 = vpop.eup %2261  ;;  %v2174_v40 = vld [vmem:[%s2991_s7 + $0x8] sm:$0xff]  ;;  %v2173_v45 = vld [vmem:[%s2991_s7] sm:$0xff]  ;;  %343 = vmatpush.bf16.msra.mxu3 %v2177_v47 }
  0x24   :  { %v190_v25 = vmul.f32 32.0, %v2262_v24  ;;  %vm194_vm4 = vweird.f32 %v2262_v24  ;;  %274 = vmatpush.bf16.msra.mxu1 %v2174_v40  ;;  %v2181_v56 = vld [vmem:[%s2991_s7 + $0x8] sm:$0xff]  ;;  %v2180_v63 = vld [vmem:[%s2991_s7] sm:$0xff] }
  0x25   :  { %v2231_v3 = vld [vmem:[%s2992_s4] ss:$0 sm:$0xff] }
  0x26   :  { %160 = vmatpush.bf16.msra.mxu0 %v2167_v8  ;;  %v191_v26 = vsub.f32 1.0, %v190_v25  ;;  %v2232_v7 = vld [vmem:[%s2993_s25] ss:$0 sm:$0xff] }
  0x28   :  { %v192_v27 = vmul.f32 %v2262_v24, %v191_v26  ;;  %275 = vmatpush.bf16.msra.mxu1 %v2173_v45  ;;  %v2591_v45 = vld [vmem:[%s2994_s3] ss:$0 sm:$0xff] }
  0x2a   :  { %161 = vmatpush.bf16.msra.mxu0 %v2166_v9  ;;  %v193_v28 = vadd.f32 %v2262_v24, %v192_v27 }
  0x2c   :  { %v2517_v29 = vsel %vm194_vm4, %v2262_v24, %v193_v28  ;;  %v2233_v24 = vld [vmem:[%s2957_s10] ss:$0 sm:$0xff] }
  0x2e   :  { %162 = vmatpush.bf16.msra.mxu0 %v2165_v10 }
  0x83   :  { %v82_v11 = vpop.permute.xlu0 %81 }
  0x84   :  { %vm86_vm0 = vcmp.eq.s32.totalorder %v82_v11, %v79_v13 }
  0x8b   :  { %v85_v14 = vpop.permute.xlu0 %84 }
  0x8c   :  { %vm87_vm1 = vcmp.eq.s32.totalorder %v85_v14, %v79_v13 }
  0x8d   :  { %vm1867_vm2 = vmpackc.low %vm87_vm1, %vm86_vm0 }
  0x8e   :  { %1868 = vmatmul.msk.bf16.vlgmr.msra.gmra.mxu0 %vm1867_vm2, %v2350_v15  ;;  %v2234_v15 = vld [vmem:[%s2958_s11] ss:$0 sm:$0xff] }
 0x10b   :  { %v164_v17 = vpop.f32.mrf.mxu0 }
 0x10c   :  { %v2509_v18 = vadd.f32 %v169_v16, %v164_v17 }
 0x10e   :  { %v183_v19 = vsel %vm182_vm3, %v2509_v18, 0.0 }
 0x10f   :  { %184 = vadd.xlane.f32.xlu1 %v183_v19 }
 0x113   :  { %v166_v20 = vpop.f32.mrf.mxu0 }
 0x114   :  { %v2513_v21 = vadd.f32 %v169_v16, %v166_v20  ;;  %v2235_v16 = vld [vmem:[%s2959_s12] ss:$0 sm:$0xff] }
 0x116   :  { %v186_v22 = vsel %vm182_vm3, %v2513_v21, 0.0 }
 0x117   :  { %187 = vadd.xlane.f32.xlu1 %v186_v22 }
 0x182   :  { %v185_v30 = vpop.xlane.xlu1 %184 }
 0x183   :  { %v196_v31 = vmul.f32 %v2517_v29, %v185_v30 }
 0x185   :  { %v198_v32 = vsub.f32 %v2509_v18, %v196_v31 }
 0x187   :  { %v200_v33 = vmul.f32 %v198_v32, %v198_v32 }
 0x189   :  { %v202_v34 = vsel %vm182_vm3, %v200_v33, 0.0 }
 0x18a   :  { %203 = vadd.xlane.f32.xlu2 %v202_v34  ;;  %v188_v35 = vpop.xlane.xlu1 %187 }
 0x18b   :  { %v197_v36 = vmul.f32 %v2517_v29, %v188_v35 }
 0x18d   :  { %v199_v37 = vsub.f32 %v2513_v21, %v197_v36 }
 0x18f   :  { %v201_v38 = vmul.f32 %v199_v37, %v199_v37 }
 0x191   :  { %v205_v39 = vsel %vm182_vm3, %v201_v38, 0.0 }
 0x192   :  { %206 = vadd.xlane.f32.xlu2 %v205_v39 }
 0x1aa   :  { %525 = vrot.lane.b32.xlu2 %v2183_v50, %s2352_s6 }
 0x1b2   :  { %485 = vrot.lane.b32.xlu2 %v2181_v56, %s2352_s6 }
 0x1ba   :  { %483 = vrot.lane.b32.xlu2 %v2180_v63, %s2352_s6  ;;  %v2615_v63 = vld [vmem:[%s2994_s3 + $0x1] ss:$0 sm:$0xff] }
 0x1fd   :  { %v204_v43 = vpop.xlane.xlu2 %203 }
 0x1fe   :  { %v208_v44 = vmul.f32 %v204_v43, %v2517_v29 }
 0x200   :  { %v210_v48 = vadd.f32 1e-05, %v208_v44 }
 0x202   :  { %2263 = vrsqrt.f32 %v210_v48  ;;  %vm218_vm6 = vweird.f32 %v210_v48 }
 0x205   :  { %v207_v49 = vpop.xlane.xlu2 %206 }
 0x206   :  { %v209_v51 = vmul.f32 %v207_v49, %v2517_v29 }
 0x208   :  { %v2264_v52 = vpop.eup %2263  ;;  %v211_v53 = vadd.f32 1e-05, %v209_v51 }
 0x209   :  { %v213_v54 = vmul.f32 %v2264_v52, %v210_v48  ;;  %vm219_vm5 = vweird.f32 %v2264_v52 }
 0x20a   :  { %2265 = vrsqrt.f32 %v211_v53  ;;  %vm220_vm7 = vmor %vm218_vm6, %vm219_vm5  ;;  %vm228_vm9 = vweird.f32 %v211_v53 }
 0x20b   :  { %v214_v55 = vmul.f32 %v2264_v52, %v213_v54  ;;  %v2238_v54 = vld [vmem:[%s2957_s10] ss:$0 sm:$0xff] }
 0x20d   :  { %v215_v57 = vmul.f32 0.5, %v214_v55  ;;  %v526_v14 = vpop.permute.xlu2 %525 }
 0x20f   :  { %v216_v58 = vsub.f32 1.5, %v215_v57 }
 0x210   :  { %v2266_v59 = vpop.eup %2265 }
 0x211   :  { %v217_v60 = vmul.f32 %v2264_v52, %v216_v58  ;;  %v223_v61 = vmul.f32 %v2266_v59, %v211_v53  ;;  %vm229_vm8 = vweird.f32 %v2266_v59  ;;  %v2237_v53 = vld [vmem:[%s2958_s11] ss:$0 sm:$0xff] }
 0x212   :  { %vm230_vm10 = vmor %vm228_vm9, %vm229_vm8 }
 0x213   :  { %v224_v62 = vmul.f32 %v2266_v59, %v223_v61  ;;  %v221_v0 = vsel %vm220_vm7, %v2264_v52, %v217_v60  ;;  %v2182_v60 = vld [vmem:[%s2955_s8] sm:$0xff]  ;;  %v2185_v61 = vld [vmem:[%s2956_s9 + $0x8] sm:$0xff] }
 0x214   :  { %v232_v4 = vmul.f32 %v221_v0, %v198_v32 }
 0x215   :  { %v225_v1 = vmul.f32 0.5, %v224_v62  ;;  %v486_v30 = vpop.permute.xlu2 %485 }
 0x216   :  { %v237_v8 = vmul.f32 %v2231_v3, %v232_v4 }
 0x217   :  { %v226_v2 = vsub.f32 1.5, %v225_v1 }
 0x218   :  { %v242_v11 = vadd.f32 %v2232_v7, %v237_v8 }
 0x219   :  { %v227_v5 = vmul.f32 %v2266_v59, %v226_v2  ;;  %v2184_v2 = vld [vmem:[%s2956_s9] sm:$0xff] }
 0x21b   :  { %v231_v6 = vsel %vm230_vm10, %v2266_v59, %v227_v5 }
 0x21c   :  { %v233_v9 = vmul.f32 %v231_v6, %v199_v37 }
 0x21d   :  { %v484_v43 = vpop.permute.xlu2 %483 }
 0x21e   :  { %v238_v10 = vmul.f32 %v2231_v3, %v233_v9 }
 0x220   :  { %v243_v12 = vadd.f32 %v2232_v7, %v238_v10 }
 0x222   :  { %v2563_v13 = vpack.c.bf16 %v243_v12, %v242_v11 }
 0x224   :  { %1877 = vmatmul.msk.bf16.vlgmr.msra.gmra.mxu1 %vm182_vm3, %v2563_v13  ;;  %1886 = vmatmul.msk.bf16.vlgmr.msra.gmra.mxu2 %vm182_vm3, %v2563_v13 }
 0x225   :  { %1895 = vmatmul.msk.bf16.vlgmr.msra.gmra.mxu3 %vm182_vm3, %v2563_v13 }
 0x2a1   :  { %v277_v22 = vpop.f32.mrf.mxu1 }
 0x2a2   :  { %v278_v31 = vadd.f32 %v2233_v24, %v277_v22 }
 0x2a4   :  { %v350_v36 = vpack.c.bf16 %v278_v31, %v278_v31 }
 0x2a7   :  { %v311_v17 = vpop.f32.mrf.mxu2 }
 0x2a8   :  { %v312_v19 = vadd.f32 %v2234_v15, %v311_v17  ;;  %v345_v20 = vpop.f32.mrf.mxu3 }
 0x2a9   :  { %v346_v23 = vadd.f32 %v2235_v16, %v345_v20  ;;  %v279_v38 = vpop.f32.mrf.mxu1 }
 0x2aa   :  { %v352_v25 = vpack.c.bf16 %v312_v19, %v312_v19  ;;  %v280_v42 = vadd.f32 %v2233_v24, %v279_v38 }
 0x2ab   :  { %v422_v26 = vpack.c.bf16 %v346_v23, %v346_v23 }
 0x2ac   :  { %v359_v27 = vsel %vm354_vm11, %v352_v25, 0  ;;  %v351_v44 = vpack.c.bf16 %v280_v42, %v280_v42 }
 0x2ad   :  { %368 = vmatpush.bf16.xpose.msrb.mxu1 %v359_v27  ;;  %v429_v28 = vsel %vm427_vm12, %v422_v26, 0 }
 0x2ae   :  { %438 = vmatpush.bf16.msrb.mxu3 %v429_v28 }
 0x2af   :  { %v313_v32 = vpop.f32.mrf.mxu2 }
 0x2b0   :  { %v314_v33 = vadd.f32 %v2234_v15, %v313_v32  ;;  %v347_v34 = vpop.f32.mrf.mxu3 }
 0x2b1   :  { %v348_v35 = vadd.f32 %v2235_v16, %v347_v34 }
 0x2b2   :  { %538 = vmatpush.bf16.msra.mxu3 %v526_v14  ;;  %v353_v37 = vpack.c.bf16 %v314_v33, %v314_v33 }
 0x2b3   :  { %v423_v39 = vpack.c.bf16 %v348_v35, %v348_v35 }
 0x2b4   :  { %1896 = vmatmul.msk.bf16.vlgmr.msrb.gmra.mxu1 %vm354_vm11, %v350_v36  ;;  %v378_v40 = vsel %vm354_vm11, %v353_v37, 0 }
 0x2b5   :  { %v448_v41 = vsel %vm427_vm12, %v423_v39, 0  ;;  %387 = vmatpush.bf16.xpose.msrb.mxu2 %v378_v40  ;;  %v2179_v40 = vld [vmem:[%s2960_s13] sm:$0xff] }
 0x2b6   :  { %457 = vmatpush.bf16.msra.mxu1 %v448_v41 }
 0x2bc   :  { %1897 = vmatmul.msk.bf16.vlgmr.msrb.gmra.mxu2 %vm354_vm11, %v351_v44 }
 0x2bd   :  { %498 = vmatpush.bf16.msra.mxu2 %v486_v30 }
 0x2c1   :  { %499 = vmatpush.bf16.msra.mxu2 %v484_v43 }
 0x2cc   :  { %1908 = vmatmul.msk.bf16.vlgmr.msra.gmra.mxu2 %vm182_vm3, %v2563_v13 }
 0x331   :  { %v370_v46 = vpop.f32.mrf.mxu1 }
 0x332   :  { %v393_v47 = vmul.f32 0.25, %v370_v46 }
 0x334   :  { %v395_v48 = vadd.f32 %v2591_v45, %v393_v47 }
 0x336   :  { %v398_v49 = vsel %vm397_vm13, %v395_v48, -inf }
 0x337   :  { %399 = vmax.xlane.f32.xlu0 %v398_v49 }
 0x339   :  { %v372_v50 = vpop.f32.mrf.mxu1 }
 0x33f   :  { %v389_v51 = vpop.f32.mrf.mxu2 }
 0x340   :  { %v394_v62 = vmul.f32 0.25, %v389_v51 }
 0x342   :  { %v396_v0 = vadd.f32 %v2615_v63, %v394_v62 }
 0x344   :  { %v401_v1 = vsel %vm397_vm13, %v396_v0, -inf }
 0x347   :  { %v391_v52 = vpop.f32.mrf.mxu2 }
 0x34b   :  { %529 = vrot.lane.b32.xlu0 %v2237_v53, %s2352_s6 }
 0x34f   :  { %v501_v25 = vpop.f32.mrf.mxu2 }
 0x353   :  { %489 = vrot.lane.b32.xlu0 %v2238_v54, %s2352_s6 }
 0x357   :  { %v503_v32 = vpop.f32.mrf.mxu2 }
 0x35b   :  { %565 = vrot.lane.b32.xlu0 %v2185_v61, %s2352_s6 }
 0x3aa   :  { %v400_v55 = vpop.xlane.xlu0 %399 }
 0x3ab   :  { %v404_v56 = vsub.f32 %v395_v48, %v400_v55 }
 0x3ad   :  { %v406_v57 = vmul.f32 1.442695, %v404_v56 }
 0x3af   :  { %2267 = vpow2.f32 %v406_v57 }
 0x3b5   :  { %v2268_v58 = vpop.eup %2267 }
 0x3b6   :  { %v410_v59 = vsel %vm397_vm13, %v2268_v58, 0.0 }
 0x3b7   :  { %411 = vadd.xlane.f32.xlu1 %v410_v59 }
 0x3bd   :  { %v530_v8 = vpop.permute.xlu0 %529 }
 0x3c5   :  { %v490_v9 = vpop.permute.xlu0 %489 }
 0x3c6   :  { %v504_v33 = vadd.f32 %v503_v32, %v490_v9  ;;  %v502_v38 = vadd.f32 %v501_v25, %v490_v9 }
 0x3c8   :  { %v587_v34 = vpack.c.bf16 %v504_v33, %v504_v33  ;;  %v586_v39 = vpack.c.bf16 %v502_v38, %v502_v38 }
 0x3cd   :  { %v566_v10 = vpop.permute.xlu0 %565 }
 0x3ce   :  { %578 = vmatpush.bf16.msrb.mxu0 %v566_v10 }
 0x3d0   :  { %523 = vrot.lane.b32.xlu1 %v2182_v60, %s2352_s6 }
 0x3fa   :  { %402 = vmax.xlane.f32.xlu1 %v401_v1 }
 0x413   :  { %563 = vrot.lane.b32.xlu1 %v2184_v2, %s2352_s6  ;;  %v2240_v2 = vld [vmem:[%s2959_s12] ss:$0 sm:$0xff] }
 0x42a   :  { %v412_v3 = vpop.xlane.xlu1 %411 }
 0x42b   :  { %2269 = vrcp.f32 %v412_v3 }
 0x431   :  { %v2270_v4 = vpop.eup %2269 }
 0x432   :  { %v418_v5 = vmul.f32 %v2270_v4, %v2268_v58 }
 0x434   :  { %v420_v6 = vpack.c.bf16 %v418_v5, %v418_v5 }
 0x436   :  { %1898 = vmatmul.msk.bf16.vlgmr.msrb.gmra.mxu3 %vm397_vm13, %v420_v6 }
 0x442   :  { %v524_v7 = vpop.permute.xlu1 %523 }
 0x443   :  { %539 = vmatpush.bf16.msra.mxu3 %v524_v7 }
 0x446   :  { %1917 = vmatmul.msk.bf16.vlgmr.msra.gmra.mxu3 %vm182_vm3, %v2563_v13 }
 0x46d   :  { %v403_v11 = vpop.xlane.xlu1 %402 }
 0x46e   :  { %v405_v12 = vsub.f32 %v396_v0, %v403_v11 }
 0x470   :  { %v408_v14 = vmul.f32 1.442695, %v405_v12 }
 0x472   :  { %2271 = vpow2.f32 %v408_v14 }
 0x478   :  { %v2272_v15 = vpop.eup %2271 }
 0x479   :  { %v413_v16 = vsel %vm397_vm13, %v2272_v15, 0.0 }
 0x47a   :  { %414 = vadd.xlane.f32.xlu2 %v413_v16 }
 0x485   :  { %v564_v17 = vpop.permute.xlu1 %563 }
 0x486   :  { %579 = vmatpush.bf16.msrb.mxu0 %v564_v17 }
 0x489   :  { %1926 = vmatmul.msk.bf16.vlgmr.msrb.gmra.mxu0 %vm182_vm3, %v2563_v13 }
 0x4b9   :  { %v440_v19 = vpop.f32.mrf.mxu3 }
 0x4c1   :  { %v442_v20 = vpop.f32.mrf.mxu3 }
 0x4c9   :  { %v541_v22 = vpop.f32.mrf.mxu3 }
 0x4ca   :  { %v542_v23 = vadd.f32 %v541_v22, %v530_v8 }
 0x4cc   :  { %v588_v24 = vpack.c.bf16 %v542_v23, %v542_v23  ;;  %v2186_v23 = vld [vmem:[%s2960_s13 + $0x8] sm:$0xff] }
 0x4ce   :  { %v594_v26 = vsel %vm354_vm11, %v588_v24, 0 }
 0x4cf   :  { %603 = vmatpush.bf16.xpose.msrb.mxu1 %v594_v26 }
 0x4d1   :  { %v543_v27 = vpop.f32.mrf.mxu3 }
 0x4d2   :  { %v544_v28 = vadd.f32 %v543_v27, %v530_v8 }
 0x4d4   :  { %v589_v30 = vpack.c.bf16 %v544_v28, %v544_v28 }
 0x4d6   :  { %v613_v31 = vsel %vm354_vm11, %v589_v30, 0 }
 0x4d7   :  { %622 = vmatpush.bf16.xpose.msrb.mxu2 %v613_v31  ;;  %v2241_v31 = vld [vmem:[%s2961_s14] ss:$0 sm:$0xff] }
 0x4de   :  { %1928 = vmatmul.msk.bf16.vlgmr.msrb.gmra.mxu2 %vm354_vm11, %v587_v34 }
 0x4df   :  { %738 = vmatpush.bf16.msra.mxu2 %v2179_v40 }
 0x4ed   :  { %v415_v13 = vpop.xlane.xlu2 %414 }
 0x4ee   :  { %2273 = vrcp.f32 %v415_v13 }
 0x4f4   :  { %v2274_v35 = vpop.eup %2273 }
 0x4f5   :  { %v419_v36 = vmul.f32 %v2274_v35, %v2272_v15 }
 0x4f7   :  { %v421_v37 = vpack.c.bf16 %v419_v36, %v419_v36 }
 0x4f9   :  { %1899 = vmatmul.msk.bf16.vlgmr.msra.gmra.mxu1 %vm397_vm13, %v421_v37 }
 0x4fa   :  { %715 = vmatpush.bf16.msra.mxu1 %v2186_v23  ;;  %v2195_v23 = vld [vmem:[%s2966_s19 + $0x30] sm:$0xff] }
 0x506   :  { %v581_v3 = vpop.f32.mrf.mxu0 }
 0x509   :  { %1927 = vmatmul.msk.bf16.vlgmr.msrb.gmra.mxu1 %vm354_vm11, %v586_v39 }
 0x50e   :  { %v583_v8 = vpop.f32.mrf.mxu0 }
 0x561   :  { %v624_v41 = vpop.f32.mrf.mxu2 }
 0x562   :  { %v629_v42 = vmul.f32 0.25, %v624_v41 }
 0x564   :  { %v631_v43 = vadd.f32 %v2615_v63, %v629_v42 }
 0x566   :  { %v635_v44 = vsel %vm397_vm13, %v631_v43, -inf }
 0x567   :  { %636 = vmax.xlane.f32.xlu2 %v635_v44 }
 0x569   :  { %v626_v46 = vpop.f32.mrf.mxu2 }
 0x576   :  { %v459_v47 = vpop.f32.mrf.mxu1 }
 0x577   :  { %v463_v48 = vpack.c.bf16 %v459_v47, %v440_v19 }
 0x579   :  { %1940 = vmatmul.msk.bf16.vlgmr.msra.gmra.mxu2 %vm354_vm11, %v463_v48 }
 0x57e   :  { %v461_v49 = vpop.f32.mrf.mxu1 }
 0x586   :  { %v605_v50 = vpop.f32.mrf.mxu1 }
 0x587   :  { %v628_v51 = vmul.f32 0.25, %v605_v50 }
 0x589   :  { %v630_v52 = vadd.f32 %v2591_v45, %v628_v51  ;;  %v2188_v51 = vld [vmem:[%s2964_s17 + $0x8] sm:$0xff] }
 0x58b   :  { %v632_v53 = vsel %vm397_vm13, %v630_v52, -inf }
 0x58c   :  { %633 = vmax.xlane.f32.xlu0 %v632_v53 }
 0x58e   :  { %v607_v54 = vpop.f32.mrf.mxu1 }
 0x5da   :  { %v637_v55 = vpop.xlane.xlu2 %636 }
 0x5db   :  { %v639_v56 = vsub.f32 %v631_v43, %v637_v55  ;;  %v2187_v55 = vld [vmem:[%s2964_s17] sm:$0xff] }
 0x5dd   :  { %v642_v57 = vmul.f32 1.442695, %v639_v56 }
 0x5df   :  { %2275 = vpow2.f32 %v642_v57 }
 0x5e5   :  { %v2276_v58 = vpop.eup %2275 }
 0x5e6   :  { %v647_v59 = vsel %vm397_vm13, %v2276_v58, 0.0 }
 0x5e7   :  { %648 = vadd.xlane.f32.xlu1 %v647_v59 }
 0x5fc   :  { %v740_v30 = vpop.f32.mrf.mxu2 }
 0x5ff   :  { %v634_v60 = vpop.xlane.xlu0 %633 }
 0x600   :  { %v638_v61 = vsub.f32 %v630_v52, %v634_v60 }
 0x602   :  { %v640_v62 = vmul.f32 1.442695, %v638_v61 }
 0x604   :  { %2277 = vpow2.f32 %v640_v62  ;;  %v742_v36 = vpop.f32.mrf.mxu2 }
 0x60a   :  { %v2278_v0 = vpop.eup %2277 }
 0x60b   :  { %v644_v1 = vsel %vm397_vm13, %v2278_v0, 0.0 }
 0x60c   :  { %645 = vadd.xlane.f32.xlu2 %v644_v1 }
 0x624   :  { %569 = vrot.lane.b32.xlu2 %v2240_v2, %s2352_s6 }
 0x65a   :  { %v649_v4 = vpop.xlane.xlu1 %648 }
 0x65b   :  { %2279 = vrcp.f32 %v649_v4 }
 0x661   :  { %v2280_v6 = vpop.eup %2279 }
 0x662   :  { %v653_v12 = vmul.f32 %v2280_v6, %v2276_v58 }
 0x664   :  { %v655_v20 = vpack.c.bf16 %v653_v12, %v653_v12  ;;  %v2243_v12 = vld [vmem:[%s2963_s16] ss:$0 sm:$0xff] }
 0x67f   :  { %v646_v5 = vpop.xlane.xlu2 %645 }
 0x680   :  { %2281 = vrcp.f32 %v646_v5 }
 0x686   :  { %v2282_v7 = vpop.eup %2281 }
 0x687   :  { %v570_v9 = vpop.permute.xlu2 %569  ;;  %v652_v14 = vmul.f32 %v2282_v7, %v2278_v0 }
 0x688   :  { %v582_v10 = vadd.f32 %v581_v3, %v570_v9  ;;  %v584_v11 = vadd.f32 %v583_v8, %v570_v9  ;;  %v2242_v8 = vld [vmem:[%s2962_s15] ss:$0 sm:$0xff] }
 0x689   :  { %v654_v22 = vpack.c.bf16 %v652_v14, %v652_v14 }
 0x68a   :  { %v656_v15 = vpack.c.bf16 %v582_v10, %v582_v10  ;;  %v657_v16 = vpack.c.bf16 %v584_v11, %v584_v11 }
 0x68c   :  { %v662_v17 = vsel %vm427_vm12, %v656_v15, 0  ;;  %v681_v19 = vsel %vm427_vm12, %v657_v16, 0 }
 0x68d   :  { %671 = vmatpush.bf16.msrb.mxu3 %v662_v17  ;;  %690 = vmatpush.bf16.msra.mxu0 %v681_v19 }
 0x690   :  { %1929 = vmatmul.msk.bf16.vlgmr.msrb.gmra.mxu3 %vm397_vm13, %v654_v22  ;;  %1930 = vmatmul.msk.bf16.vlgmr.msra.gmra.mxu0 %vm397_vm13, %v655_v20  ;;  %v2196_v22 = vld [vmem:[%s2966_s19 + $0x38] sm:$0xff] }
 0x691   :  { %839 = vmatpush.bf16.msra.mxu3 %v2188_v51  ;;  %934 = vmatpush.bf16.msrb.mxu0 %v2196_v22  ;;  %v2206_v22 = vld [vmem:[%s2955_s8 + $0x10] sm:$0xff] }
 0x695   :  { %840 = vmatpush.bf16.msra.mxu3 %v2187_v55  ;;  %935 = vmatpush.bf16.msrb.mxu0 %v2195_v23  ;;  %v2245_v55 = vld [vmem:[%s2967_s20] ss:$0 sm:$0xff]  ;;  %v2207_v23 = vld [vmem:[%s2955_s8 + $0x18] sm:$0xff] }
 0x70d   :  { %v692_v24 = vpop.f32.mrf.mxu0 }
 0x713   :  { %v673_v25 = vpop.f32.mrf.mxu3 }
 0x714   :  { %v696_v26 = vpack.c.bf16 %v692_v24, %v673_v25  ;;  %v2194_v24 = vld [vmem:[%s2966_s19 + $0x28] sm:$0xff]  ;;  %v2193_v25 = vld [vmem:[%s2966_s19 + $0x20] sm:$0xff] }
 0x715   :  { %v694_v27 = vpop.f32.mrf.mxu0  ;;  %936 = vmatpush.bf16.msrb.mxu0 %v2194_v24 }
 0x716   :  { %1935 = vmatmul.msk.bf16.vlgmr.msra.gmra.mxu1 %vm354_vm11, %v696_v26  ;;  %v2192_v26 = vld [vmem:[%s2966_s19 + $0x18] sm:$0xff]  ;;  %v2191_v27 = vld [vmem:[%s2966_s19 + $0x10] sm:$0xff] }
 0x719   :  { %937 = vmatpush.bf16.msrb.mxu0 %v2193_v25  ;;  %v2205_v25 = vld [vmem:[%s2991_s7 + $0x18] sm:$0xff] }
 0x71b   :  { %v675_v28 = vpop.f32.mrf.mxu3 }
 0x71c   :  { %v2190_v28 = vld [vmem:[%s2966_s19 + $0x8] sm:$0xff] }
 0x71d   :  { %938 = vmatpush.bf16.msrb.mxu0 %v2192_v26 }
 0x721   :  { %939 = vmatpush.bf16.msrb.mxu0 %v2191_v27 }
 0x725   :  { %940 = vmatpush.bf16.msrb.mxu0 %v2190_v28 }
 0x793   :  { %v717_v32 = vpop.f32.mrf.mxu1 }
 0x794   :  { %v741_v33 = vadd.f32 %v740_v30, %v717_v32  ;;  %v2189_v30 = vld [vmem:[%s2966_s19] sm:$0xff] }
 0x795   :  { %941 = vmatpush.bf16.msrb.mxu0 %v2189_v30 }
 0x796   :  { %v749_v34 = vadd.f32 %v2241_v31, %v741_v33 }
 0x798   :  { %v2660_v13 = vadd.f32 %v749_v34, %v2509_v18 }
 0x79a   :  { %v755_v35 = vsel %vm182_vm3, %v2660_v13, 0.0 }
 0x79b   :  { %756 = vadd.xlane.f32.xlu0 %v755_v35  ;;  %v719_v37 = vpop.f32.mrf.mxu1 }
 0x79c   :  { %v743_v38 = vadd.f32 %v742_v36, %v719_v37 }
 0x79e   :  { %v750_v39 = vadd.f32 %v2241_v31, %v743_v38  ;;  %v2244_v31 = vld [vmem:[%s2995_s29] ss:$0 sm:$0xff] }
 0x7a0   :  { %v2665_v40 = vadd.f32 %v750_v39, %v2513_v21 }
 0x7a2   :  { %v758_v41 = vsel %vm182_vm3, %v2665_v40, 0.0 }
 0x7a3   :  { %759 = vadd.xlane.f32.xlu2 %v758_v41 }
 0x7bb   :  { %1253 = vrot.lane.b32.xlu2 %v2205_v25, %s2352_s6 }
 0x80e   :  { %v757_v42 = vpop.xlane.xlu0 %756 }
 0x80f   :  { %v761_v43 = vmul.f32 %v757_v42, %v2517_v29 }
 0x811   :  { %v763_v18 = vsub.f32 %v2660_v13, %v761_v43 }
 0x813   :  { %v765_v44 = vmul.f32 %v763_v18, %v763_v18 }
 0x815   :  { %v767_v46 = vsel %vm182_vm3, %v765_v44, 0.0 }
 0x816   :  { %768 = vadd.xlane.f32.xlu0 %v767_v46  ;;  %v760_v47 = vpop.xlane.xlu2 %759 }
 0x817   :  { %v762_v48 = vmul.f32 %v760_v47, %v2517_v29 }
 0x819   :  { %v764_v49 = vsub.f32 %v2665_v40, %v762_v48 }
 0x81b   :  { %v766_v21 = vmul.f32 %v764_v49, %v764_v49 }
 0x81d   :  { %v770_v50 = vsel %vm182_vm3, %v766_v21, 0.0 }
 0x81e   :  { %771 = vadd.xlane.f32.xlu0 %v770_v50 }
 0x889   :  { %v769_v52 = vpop.xlane.xlu0 %768 }
 0x88a   :  { %v773_v53 = vmul.f32 %v769_v52, %v2517_v29 }
 0x88c   :  { %v775_v54 = vadd.f32 1e-05, %v773_v53 }
 0x88e   :  { %2283 = vrsqrt.f32 %v775_v54  ;;  %vm783_vm15 = vweird.f32 %v775_v54 }
 0x891   :  { %v772_v56 = vpop.xlane.xlu0 %771 }
 0x892   :  { %v774_v57 = vmul.f32 %v772_v56, %v2517_v29 }
 0x894   :  { %v2284_v58 = vpop.eup %2283  ;;  %v776_v59 = vadd.f32 1e-05, %v774_v57 }
 0x895   :  { %v778_v60 = vmul.f32 %v2284_v58, %v775_v54  ;;  %vm784_vm14 = vweird.f32 %v2284_v58 }
 0x896   :  { %2285 = vrsqrt.f32 %v776_v59  ;;  %vm785_vm0 = vmor %vm783_vm15, %vm784_vm14  ;;  %vm793_vm2 = vweird.f32 %v776_v59 }
 0x897   :  { %v779_v61 = vmul.f32 %v2284_v58, %v778_v60 }
 0x899   :  { %v780_v62 = vmul.f32 0.5, %v779_v61 }
 0x89b   :  { %v781_v0 = vsub.f32 1.5, %v780_v62 }
 0x89c   :  { %v2286_v1 = vpop.eup %2285 }
 0x89d   :  { %v782_v2 = vmul.f32 %v2284_v58, %v781_v0  ;;  %v788_v3 = vmul.f32 %v2286_v1, %v776_v59  ;;  %vm794_vm1 = vweird.f32 %v2286_v1 }
 0x89e   :  { %vm795_vm4 = vmor %vm793_vm2, %vm794_vm1 }
 0x89f   :  { %v789_v4 = vmul.f32 %v2286_v1, %v788_v3  ;;  %v786_v5 = vsel %vm785_vm0, %v2284_v58, %v782_v2 }
 0x8a0   :  { %v797_v9 = vmul.f32 %v786_v5, %v763_v18 }
 0x8a1   :  { %v790_v6 = vmul.f32 0.5, %v789_v4 }
 0x8a2   :  { %v802_v14 = vmul.f32 %v2242_v8, %v797_v9  ;;  %v2198_v9 = vld [vmem:[%s2991_s7 + $0x18] sm:$0xff] }
 0x8a3   :  { %v791_v7 = vsub.f32 1.5, %v790_v6  ;;  %1040 = vmatpush.bf16.msrb.mxu1 %v2198_v9 }
 0x8a4   :  { %v807_v17 = vadd.f32 %v2243_v12, %v802_v14 }
 0x8a5   :  { %v792_v10 = vmul.f32 %v2286_v1, %v791_v7 }
 0x8a7   :  { %v796_v11 = vsel %vm795_vm4, %v2286_v1, %v792_v10  ;;  %v2200_v10 = vld [vmem:[%s2955_s8 + $0x18] sm:$0xff] }
 0x8a8   :  { %v798_v15 = vmul.f32 %v796_v11, %v764_v49  ;;  %v2202_v11 = vld [vmem:[%s2956_s9 + $0x18] sm:$0xff]  ;;  %1076 = vmatpush.bf16.msrb.mxu2 %v2200_v10 }
 0x8a9   :  { %1112 = vmatpush.bf16.msrb.mxu3 %v2202_v11 }
 0x8aa   :  { %v803_v16 = vmul.f32 %v2242_v8, %v798_v15 }
 0x8ac   :  { %v808_v19 = vadd.f32 %v2243_v12, %v803_v16  ;;  %v2197_v16 = vld [vmem:[%s2991_s7 + $0x10] sm:$0xff] }
 0x8ad   :  { %1041 = vmatpush.bf16.msrb.mxu1 %v2197_v16 }
 0x8ae   :  { %v809_v20 = vpack.c.bf16 %v808_v19, %v807_v17  ;;  %v2199_v17 = vld [vmem:[%s2955_s8 + $0x10] sm:$0xff] }
 0x8af   :  { %v2201_v19 = vld [vmem:[%s2956_s9 + $0x10] sm:$0xff]  ;;  %1077 = vmatpush.bf16.msrb.mxu2 %v2199_v17 }
 0x8b0   :  { %1949 = vmatmul.msk.bf16.vlgmr.msra.gmra.mxu3 %vm182_vm3, %v809_v20 }
 0x8b1   :  { %1113 = vmatpush.bf16.msrb.mxu3 %v2201_v19 }
 0x933   :  { %v842_v32 = vpop.f32.mrf.mxu3 }
 0x934   :  { %v843_v33 = vadd.f32 %v2244_v31, %v842_v32 }
 0x936   :  { %v849_v34 = vmul.f32 0.044715, %v843_v33  ;;  %v847_v21 = vmul.f32 0.5, %v843_v33 }
 0x938   :  { %v851_v35 = vmul.f32 %v849_v34, %v843_v33 }
 0x93a   :  { %v853_v36 = vmul.f32 %v851_v35, %v843_v33 }
 0x93b   :  { %v844_v37 = vpop.f32.mrf.mxu3 }
 0x93c   :  { %v855_v38 = vadd.f32 %v853_v36, %v843_v33  ;;  %v845_v39 = vadd.f32 %v2244_v31, %v844_v37  ;;  %v2204_v31 = vld [vmem:[%s2991_s7 + $0x10] sm:$0xff] }
 0x93e   :  { %v850_v41 = vmul.f32 0.044715, %v845_v39  ;;  %v857_v42 = vmul.f32 0.7978846, %v855_v38  ;;  %v848_v50 = vmul.f32 0.5, %v845_v39 }
 0x940   :  { %v852_v43 = vmul.f32 %v850_v41, %v845_v39  ;;  %2287 = vtanh.f32 %v857_v42  ;;  %v2246_v42 = vld [vmem:[%s2992_s4 + $0x1] ss:$0 sm:$0xff] }
 0x942   :  { %v854_v18 = vmul.f32 %v852_v43, %v845_v39 }
 0x944   :  { %v856_v44 = vadd.f32 %v854_v18, %v845_v39 }
 0x946   :  { %v858_v46 = vmul.f32 0.7978846, %v856_v44  ;;  %v2288_v47 = vpop.eup %2287 }
 0x947   :  { %v861_v48 = vadd.f32 1.0, %v2288_v47 }
 0x948   :  { %2289 = vtanh.f32 %v858_v46  ;;  %v2247_v46 = vld [vmem:[%s2993_s25 + $0x1] ss:$0 sm:$0xff]  ;;  %s2996_s25 = sld [smem:[#allocation8_spill]] }
 0x949   :  { %v863_v52 = vmul.f32 %v861_v48, %v847_v21 }
 0x94e   :  { %v2290_v49 = vpop.eup %2289 }
 0x94f   :  { %v862_v51 = vadd.f32 1.0, %v2290_v49 }
 0x951   :  { %v864_v53 = vmul.f32 %v862_v51, %v848_v50 }
 0x953   :  { %v865_v54 = vpack.c.bf16 %v864_v53, %v863_v52  ;;  %v2249_v52 = vld [vmem:[%s2958_s11 + $0x1] ss:$0 sm:$0xff] }
 0x954   :  { %v2251_v53 = vld [vmem:[%s2958_s11 + $0x1] ss:$0 sm:$0xff] }
 0x955   :  { %942 = vmatmul.bf16.vlgmr.msrb.gmra.mxu0 %v865_v54  ;;  %v2250_v54 = vld [vmem:[%s2959_s12 + $0x1] ss:$0 sm:$0xff] }
 0x9d2   :  { %v943_v56 = vpop.f32.mrf.mxu0 }
 0x9d3   :  { %v944_v57 = vadd.f32 %v2245_v55, %v943_v56 }
 0x9d5   :  { %v2721_v58 = vadd.f32 %v944_v57, %v2660_v13 }
 0x9d7   :  { %v954_v59 = vsel %vm182_vm3, %v2721_v58, 0.0 }
 0x9d8   :  { %955 = vadd.xlane.f32.xlu1 %v954_v59 }
 0x9da   :  { %v945_v60 = vpop.f32.mrf.mxu0 }
 0x9db   :  { %v946_v61 = vadd.f32 %v2245_v55, %v945_v60 }
 0x9dd   :  { %v2726_v62 = vadd.f32 %v946_v61, %v2665_v40 }
 0x9df   :  { %v957_v0 = vsel %vm182_vm3, %v2726_v62, 0.0 }
 0x9e0   :  { %958 = vadd.xlane.f32.xlu0 %v957_v0  ;;  %v2248_v0 = vld [vmem:[%s2957_s10 + $0x1] ss:$0 sm:$0xff] }
 0xa4b   :  { %v956_v1 = vpop.xlane.xlu1 %955 }
 0xa4c   :  { %v960_v2 = vmul.f32 %v956_v1, %v2517_v29 }
 0xa4e   :  { %v962_v3 = vsub.f32 %v2721_v58, %v960_v2 }
 0xa50   :  { %v964_v13 = vmul.f32 %v962_v3, %v962_v3 }
 0xa52   :  { %v966_v4 = vsel %vm182_vm3, %v964_v13, 0.0 }
 0xa53   :  { %v959_v5 = vpop.xlane.xlu0 %958  ;;  %967 = vadd.xlane.f32.xlu1 %v966_v4  ;;  %v2252_v4 = vld [vmem:[%s2957_s10 + $0x1] ss:$0 sm:$0xff]  ;;  %s1823_s10 = sshll.u32 %s2970_s23, 4  ;;  %s1824_s10 = int_to_ptr.hbm [resolvable:$true] %s1823_s10 }
 0xa54   :  { %v961_v6 = vmul.f32 %v959_v5, %v2517_v29 }
 0xa56   :  { %v963_v7 = vsub.f32 %v2726_v62, %v961_v6 }
 0xa58   :  { %v965_v40 = vmul.f32 %v963_v7, %v963_v7 }
 0xa5a   :  { %v969_v8 = vsel %vm182_vm3, %v965_v40, 0.0 }
 0xa5b   :  { %970 = vadd.xlane.f32.xlu0 %v969_v8 }
 0xa6c   :  { %1293 = vrot.lane.b32.xlu1 %v2207_v23, %s2352_s6 }
 0xa6f   :  { %1291 = vrot.lane.b32.xlu0 %v2206_v22, %s2352_s6 }
 0xa77   :  { %1251 = vrot.lane.b32.xlu0 %v2204_v31, %s2352_s6 }
 0xa7f   :  { %1297 = vrot.lane.b32.xlu0 %v2251_v53, %s2352_s6 }
 0xa87   :  { %1257 = vrot.lane.b32.xlu0 %v2252_v4, %s2352_s6 }
 0xac6   :  { %v968_v12 = vpop.xlane.xlu1 %967 }
 0xac7   :  { %v972_v14 = vmul.f32 %v968_v12, %v2517_v29 }
 0xac9   :  { %v974_v15 = vadd.f32 1e-05, %v972_v14 }
 0xacb   :  { %2291 = vrsqrt.f32 %v974_v15  ;;  %vm982_vm6 = vweird.f32 %v974_v15 }
 0xace   :  { %v971_v20 = vpop.xlane.xlu0 %970 }
 0xacf   :  { %v973_v24 = vmul.f32 %v971_v20, %v2517_v29 }
 0xad1   :  { %v2292_v26 = vpop.eup %2291  ;;  %v975_v27 = vadd.f32 1e-05, %v973_v24 }
 0xad2   :  { %v977_v28 = vmul.f32 %v2292_v26, %v974_v15  ;;  %vm983_vm5 = vweird.f32 %v2292_v26 }
 0xad3   :  { %2293 = vrsqrt.f32 %v975_v27  ;;  %vm984_vm7 = vmor %vm982_vm6, %vm983_vm5  ;;  %vm992_vm9 = vweird.f32 %v975_v27 }
 0xad4   :  { %v978_v30 = vmul.f32 %v2292_v26, %v977_v28 }
 0xad6   :  { %v979_v32 = vmul.f32 0.5, %v978_v30 }
 0xad8   :  { %v980_v33 = vsub.f32 1.5, %v979_v32 }
 0xad9   :  { %v2294_v34 = vpop.eup %2293 }
 0xada   :  { %v981_v35 = vmul.f32 %v2292_v26, %v980_v33  ;;  %v987_v36 = vmul.f32 %v2294_v34, %v975_v27  ;;  %vm993_vm8 = vweird.f32 %v2294_v34 }
 0xadb   :  { %vm994_vm10 = vmor %vm992_vm9, %vm993_vm8 }
 0xadc   :  { %v988_v37 = vmul.f32 %v2294_v34, %v987_v36  ;;  %v985_v38 = vsel %vm984_vm7, %v2292_v26, %v981_v35 }
 0xadd   :  { %v996_v43 = vmul.f32 %v985_v38, %v962_v3  ;;  %v1254_v3 = vpop.permute.xlu2 %1253 }
 0xade   :  { %v989_v39 = vmul.f32 0.5, %v988_v37  ;;  %v1294_v16 = vpop.permute.xlu1 %1293 }
 0xadf   :  { %v1001_v47 = vmul.f32 %v2246_v42, %v996_v43 }
 0xae0   :  { %v990_v41 = vsub.f32 1.5, %v989_v39 }
 0xae1   :  { %v1006_v21 = vadd.f32 %v2247_v46, %v1001_v47  ;;  %v1292_v55 = vpop.permute.xlu0 %1291 }
 0xae2   :  { %v991_v18 = vmul.f32 %v2294_v34, %v990_v41 }
 0xae4   :  { %v995_v44 = vsel %vm994_vm10, %v2294_v34, %v991_v18 }
 0xae5   :  { %v997_v48 = vmul.f32 %v995_v44, %v963_v7 }
 0xae7   :  { %v1002_v49 = vmul.f32 %v2246_v42, %v997_v48 }
 0xae9   :  { %v1007_v50 = vadd.f32 %v2247_v46, %v1002_v49  ;;  %v1252_v40 = vpop.permute.xlu0 %1251 }
 0xaeb   :  { %v2778_v51 = vpack.c.bf16 %v1007_v50, %v1006_v21 }
 0xaed   :  { %1997 = vmatmul.msk.bf16.vlgmr.msrb.gmra.mxu1 %vm182_vm3, %v2778_v51  ;;  %2011 = vmatmul.msk.bf16.vlgmr.msrb.gmra.mxu2 %vm182_vm3, %v2778_v51 }
 0xaee   :  { %2025 = vmatmul.msk.bf16.vlgmr.msrb.gmra.mxu3 %vm182_vm3, %v2778_v51 }
 0xaf1   :  { %v1298_v34 = vpop.permute.xlu0 %1297 }
 0xaf9   :  { %v1258_v46 = vpop.permute.xlu0 %1257 }
 0xb6a   :  { %v1043_v60 = vpop.f32.mrf.mxu1 }
 0xb6b   :  { %v1044_v6 = vadd.f32 %v2248_v0, %v1043_v60  ;;  %v2208_v60 = vld [vmem:[%s2956_s9 + $0x10] sm:$0xff] }
 0xb6d   :  { %v1120_v11 = vpack.c.bf16 %v1044_v6, %v1044_v6 }
 0xb70   :  { %v1079_v56 = vpop.f32.mrf.mxu2 }
 0xb71   :  { %v1080_v57 = vadd.f32 %v2249_v52, %v1079_v56  ;;  %v1115_v59 = vpop.f32.mrf.mxu3 }
 0xb72   :  { %v1116_v61 = vadd.f32 %v2250_v54, %v1115_v59  ;;  %v1045_v14 = vpop.f32.mrf.mxu1 }
 0xb73   :  { %v1122_v1 = vpack.c.bf16 %v1080_v57, %v1080_v57  ;;  %v1046_v20 = vadd.f32 %v2248_v0, %v1045_v14 }
 0xb74   :  { %v1190_v2 = vpack.c.bf16 %v1116_v61, %v1116_v61  ;;  %v2209_v61 = vld [vmem:[%s2956_s9 + $0x18] sm:$0xff] }
 0xb75   :  { %v1128_v13 = vsel %vm354_vm11, %v1122_v1, 0  ;;  %v1121_v22 = vpack.c.bf16 %v1046_v20, %v1046_v20 }
 0xb76   :  { %v1196_v5 = vsel %vm427_vm12, %v1190_v2, 0  ;;  %1137 = vmatpush.bf16.xpose.msra.mxu1 %v1128_v13 }
 0xb77   :  { %1205 = vmatpush.bf16.msra.mxu3 %v1196_v5 }
 0xb78   :  { %v1081_v7 = vpop.f32.mrf.mxu2 }
 0xb79   :  { %v1082_v8 = vadd.f32 %v2249_v52, %v1081_v7  ;;  %v1117_v9 = vpop.f32.mrf.mxu3 }
 0xb7a   :  { %v1118_v10 = vadd.f32 %v2250_v54, %v1117_v9 }
 0xb7b   :  { %v1123_v12 = vpack.c.bf16 %v1082_v8, %v1082_v8 }
 0xb7c   :  { %v1191_v15 = vpack.c.bf16 %v1118_v10, %v1118_v10 }
 0xb7d   :  { %v1147_v17 = vsel %vm354_vm11, %v1123_v12, 0  ;;  %2026 = vmatmul.msk.bf16.vlgmr.msra.gmra.mxu1 %vm354_vm11, %v1120_v11 }
 0xb7e   :  { %1266 = vmatpush.bf16.msrb.mxu1 %v1254_v3  ;;  %v1215_v19 = vsel %vm427_vm12, %v1191_v15, 0  ;;  %1156 = vmatpush.bf16.xpose.msra.mxu2 %v1147_v17 }
 0xb7f   :  { %1224 = vmatpush.bf16.msra.mxu0 %v1215_v19 }
 0xb82   :  { %1267 = vmatpush.bf16.msrb.mxu1 %v1252_v40 }
 0xb85   :  { %2027 = vmatmul.msk.bf16.vlgmr.msra.gmra.mxu2 %vm354_vm11, %v1121_v22  ;;  %v2203_v22 = vld [vmem:[%s2960_s13 + $0x10] sm:$0xff] }
 0xb86   :  { %1306 = vmatpush.bf16.msrb.mxu2 %v1294_v16 }
 0xb8a   :  { %1307 = vmatpush.bf16.msrb.mxu2 %v1292_v55 }
 0xb8d   :  { %2045 = vmatmul.msk.bf16.vlgmr.msrb.gmra.mxu1 %vm182_vm3, %v2778_v51 }
 0xb95   :  { %2059 = vmatmul.msk.bf16.vlgmr.msrb.gmra.mxu2 %vm182_vm3, %v2778_v51 }
 0xbfa   :  { %v1139_v23 = vpop.f32.mrf.mxu1 }
 0xbfb   :  { %v1162_v24 = vmul.f32 0.25, %v1139_v23 }
 0xbfd   :  { %v1164_v25 = vadd.f32 %v2591_v45, %v1162_v24 }
 0xbff   :  { %v1166_v26 = vsel %vm397_vm13, %v1164_v25, -inf }
 0xc00   :  { %1167 = vmax.xlane.f32.xlu0 %v1166_v26 }
 0xc02   :  { %v1141_v27 = vpop.f32.mrf.mxu1 }
 0xc08   :  { %v1158_v28 = vpop.f32.mrf.mxu2 }
 0xc09   :  { %v1163_v30 = vmul.f32 0.25, %v1158_v28 }
 0xc0a   :  { %v1269_v37 = vpop.f32.mrf.mxu1 }
 0xc0b   :  { %v1165_v31 = vadd.f32 %v2615_v63, %v1163_v30 }
 0xc0d   :  { %v1169_v32 = vsel %vm397_vm13, %v1165_v31, -inf }
 0xc0e   :  { %1170 = vmax.xlane.f32.xlu1 %v1169_v32 }
 0xc10   :  { %v1160_v33 = vpop.f32.mrf.mxu2 }
 0xc12   :  { %v1271_v18 = vpop.f32.mrf.mxu1 }
 0xc13   :  { %v1272_v47 = vadd.f32 %v1271_v18, %v1258_v46 }
 0xc15   :  { %v1355_v48 = vpack.c.bf16 %v1272_v47, %v1272_v47 }
 0xc18   :  { %v1309_v35 = vpop.f32.mrf.mxu2 }
 0xc19   :  { %v1310_v36 = vadd.f32 %v1309_v35, %v1298_v34 }
 0xc1b   :  { %v1356_v38 = vpack.c.bf16 %v1310_v36, %v1310_v36 }
 0xc1d   :  { %v1362_v39 = vsel %vm354_vm11, %v1356_v38, 0  ;;  %v2253_v38 = vld [vmem:[%s2959_s12 + $0x1] ss:$0 sm:$0xff] }
 0xc1e   :  { %1371 = vmatpush.bf16.xpose.msrb.mxu0 %v1362_v39 }
 0xc20   :  { %v1311_v41 = vpop.f32.mrf.mxu2 }
 0xc21   :  { %v1312_v42 = vadd.f32 %v1311_v41, %v1298_v34 }
 0xc23   :  { %v1357_v43 = vpack.c.bf16 %v1312_v42, %v1312_v42 }
 0xc25   :  { %v1381_v44 = vsel %vm354_vm11, %v1357_v43, 0 }
 0xc26   :  { %1390 = vmatpush.bf16.xpose.msra.mxu1 %v1381_v44 }
 0xc2d   :  { %2075 = vmatmul.msk.bf16.vlgmr.msra.gmra.mxu1 %vm354_vm11, %v1355_v48 }
 0xc2e   :  { %1506 = vmatpush.bf16.msrb.mxu1 %v2203_v22  ;;  %v2212_v22 = vld [vmem:[%s2964_s17 + $0x18] sm:$0xff] }
 0xc73   :  { %v1168_v49 = vpop.xlane.xlu0 %1167 }
 0xc74   :  { %v1172_v21 = vsub.f32 %v1164_v25, %v1168_v49 }
 0xc76   :  { %v1174_v50 = vmul.f32 1.442695, %v1172_v21 }
 0xc78   :  { %2295 = vpow2.f32 %v1174_v50 }
 0xc7e   :  { %v2296_v52 = vpop.eup %2295 }
 0xc7f   :  { %v1178_v53 = vsel %vm397_vm13, %v2296_v52, 0.0 }
 0xc80   :  { %1179 = vadd.xlane.f32.xlu1 %v1178_v53 }
 0xc81   :  { %v1171_v54 = vpop.xlane.xlu1 %1170 }
 0xc82   :  { %v1173_v55 = vsub.f32 %v1165_v31, %v1171_v54 }
 0xc84   :  { %v1176_v56 = vmul.f32 1.442695, %v1173_v55 }
 0xc86   :  { %2297 = vpow2.f32 %v1176_v56  ;;  %v2210_v56 = vld [vmem:[%s2960_s13 + $0x18] sm:$0xff] }
 0xc8c   :  { %v2298_v57 = vpop.eup %2297 }
 0xc8d   :  { %v1181_v59 = vsel %vm397_vm13, %v2298_v57, 0.0 }
 0xc8e   :  { %1182 = vadd.xlane.f32.xlu2 %v1181_v59 }
 0xc99   :  { %1331 = vrot.lane.b32.xlu1 %v2208_v60, %s2352_s6 }
 0xca6   :  { %1333 = vrot.lane.b32.xlu2 %v2209_v61, %s2352_s6 }
 0xcaa   :  { %v1392_v0 = vpop.f32.mrf.mxu1 }
 0xcab   :  { %v1397_v2 = vmul.f32 0.25, %v1392_v0 }
 0xcad   :  { %v1399_v3 = vadd.f32 %v2615_v63, %v1397_v2  ;;  %v1270_v63 = vadd.f32 %v1269_v37, %v1258_v46  ;;  %v2254_v2 = vld [vmem:[%s2961_s14 + $0x1] ss:$0 sm:$0xff] }
 0xcaf   :  { %v1403_v13 = vsel %vm397_vm13, %v1399_v3, -inf  ;;  %v1354_v14 = vpack.c.bf16 %v1270_v63, %v1270_v63 }
 0xcb2   :  { %v1394_v1 = vpop.f32.mrf.mxu1 }
 0xccf   :  { %1404 = vmax.xlane.f32.xlu2 %v1403_v13 }
 0xcf3   :  { %v1180_v4 = vpop.xlane.xlu1 %1179 }
 0xcf4   :  { %2299 = vrcp.f32 %v1180_v4 }
 0xcfa   :  { %v2300_v5 = vpop.eup %2299 }
 0xcfb   :  { %v1186_v6 = vmul.f32 %v2300_v5, %v2296_v52 }
 0xcfd   :  { %v1188_v7 = vpack.c.bf16 %v1186_v6, %v1186_v6 }
 0xcff   :  { %2028 = vmatmul.msk.bf16.vlgmr.msra.gmra.mxu3 %vm397_vm13, %v1188_v7 }
 0xd01   :  { %v1183_v40 = vpop.xlane.xlu2 %1182 }
 0xd02   :  { %2301 = vrcp.f32 %v1183_v40 }
 0xd08   :  { %v2302_v8 = vpop.eup %2301 }
 0xd09   :  { %v1187_v9 = vmul.f32 %v2302_v8, %v2298_v57  ;;  %v1334_v10 = vpop.permute.xlu2 %1333 }
 0xd0a   :  { %1346 = vmatpush.bf16.msrb.mxu3 %v1334_v10 }
 0xd0b   :  { %v1189_v11 = vpack.c.bf16 %v1187_v9, %v1187_v9  ;;  %v1332_v12 = vpop.permute.xlu1 %1331 }
 0xd0d   :  { %2029 = vmatmul.msk.bf16.vlgmr.msra.gmra.mxu0 %vm397_vm13, %v1189_v11 }
 0xd0e   :  { %1347 = vmatpush.bf16.msrb.mxu3 %v1332_v12  ;;  %1483 = vmatpush.bf16.msra.mxu0 %v2210_v56  ;;  %v2217_v56 = vld [vmem:[%s2966_s19 + $0x60] sm:$0xff] }
 0xd11   :  { %2073 = vmatmul.msk.bf16.vlgmr.msrb.gmra.mxu3 %vm182_vm3, %v2778_v51 }
 0xd1d   :  { %2074 = vmatmul.msk.bf16.vlgmr.msrb.gmra.mxu0 %vm354_vm11, %v1354_v14 }
 0xd42   :  { %v1405_v15 = vpop.xlane.xlu2 %1404 }
 0xd43   :  { %v1407_v16 = vsub.f32 %v1399_v3, %v1405_v15 }
 0xd45   :  { %v1410_v17 = vmul.f32 1.442695, %v1407_v16 }
 0xd47   :  { %2303 = vpow2.f32 %v1410_v17 }
 0xd4d   :  { %v2304_v19 = vpop.eup %2303 }
 0xd4e   :  { %v1415_v20 = vsel %vm397_vm13, %v2304_v19, 0.0 }
 0xd4f   :  { %1416 = vadd.xlane.f32.xlu1 %v1415_v20 }
 0xd82   :  { %v1207_v23 = vpop.f32.mrf.mxu3 }
 0xd8a   :  { %v1209_v24 = vpop.f32.mrf.mxu3  ;;  %v1226_v51 = vpop.f32.mrf.mxu0 }
 0xd8b   :  { %v1230_v25 = vpack.c.bf16 %v1226_v51, %v1207_v23 }
 0xd8d   :  { %2089 = vmatmul.msk.bf16.vlgmr.msrb.gmra.mxu1 %vm354_vm11, %v1230_v25  ;;  %v2211_v25 = vld [vmem:[%s2964_s17 + $0x10] sm:$0xff] }
 0xd92   :  { %v1228_v26 = vpop.f32.mrf.mxu0 }
 0xd94   :  { %v1349_v39 = vpop.f32.mrf.mxu3 }
 0xd9a   :  { %v1373_v27 = vpop.f32.mrf.mxu0 }
 0xd9b   :  { %v1396_v28 = vmul.f32 0.25, %v1373_v27 }
 0xd9c   :  { %v1351_v18 = vpop.f32.mrf.mxu3 }
 0xd9d   :  { %v1398_v30 = vadd.f32 %v2591_v45, %v1396_v28 }
 0xd9f   :  { %v1400_v31 = vsel %vm397_vm13, %v1398_v30, -inf }
 0xda0   :  { %1401 = vmax.xlane.f32.xlu0 %v1400_v31 }
 0xda2   :  { %v1375_v32 = vpop.f32.mrf.mxu0 }
 0xdc2   :  { %v1417_v45 = vpop.xlane.xlu1 %1416 }
 0xe0a   :  { %v1508_v1 = vpop.f32.mrf.mxu1 }
 0xe12   :  { %v1510_v7 = vpop.f32.mrf.mxu1 }
 0xe13   :  { %v1402_v33 = vpop.xlane.xlu0 %1401 }
 0xe14   :  { %v1406_v34 = vsub.f32 %v1398_v30, %v1402_v33 }
 0xe16   :  { %v1408_v35 = vmul.f32 1.442695, %v1406_v34 }
 0xe18   :  { %2305 = vpow2.f32 %v1408_v35 }
 0xe19   :  { %2307 = vrcp.f32 %v1417_v45 }
 0xe1e   :  { %v2306_v36 = vpop.eup %2305 }
 0xe1f   :  { %v1412_v37 = vsel %vm397_vm13, %v2306_v36, 0.0  ;;  %v2308_v42 = vpop.eup %2307 }
 0xe20   :  { %1413 = vadd.xlane.f32.xlu0 %v1412_v37  ;;  %v1421_v48 = vmul.f32 %v2308_v42, %v2304_v19  ;;  %v2255_v42 = vld [vmem:[%s2962_s15 + $0x1] ss:$0 sm:$0xff] }
 0xe22   :  { %v1423_v54 = vpack.c.bf16 %v1421_v48, %v1421_v48 }
 0xe34   :  { %1337 = vrot.lane.b32.xlu0 %v2253_v38, %s2352_s6 }
 0xe93   :  { %v1414_v41 = vpop.xlane.xlu0 %1413 }
 0xe94   :  { %2309 = vrcp.f32 %v1414_v41 }
 0xe9a   :  { %v2310_v43 = vpop.eup %2309 }
 0xe9b   :  { %v1420_v49 = vmul.f32 %v2310_v43, %v2306_v36 }
 0xe9d   :  { %v1422_v55 = vpack.c.bf16 %v1420_v49, %v1420_v49 }
 0xea6   :  { %v1338_v44 = vpop.permute.xlu0 %1337 }
 0xea7   :  { %v1350_v46 = vadd.f32 %v1349_v39, %v1338_v44  ;;  %v1352_v47 = vadd.f32 %v1351_v18, %v1338_v44 }
 0xea9   :  { %v1424_v21 = vpack.c.bf16 %v1350_v46, %v1350_v46  ;;  %v1425_v50 = vpack.c.bf16 %v1352_v47, %v1352_v47  ;;  %v2256_v46 = vld [vmem:[%s2963_s16 + $0x1] ss:$0 sm:$0xff]  ;;  %s2355_s16 = smov 8  }
 0xeab   :  { %v1430_v52 = vsel %vm427_vm12, %v1424_v21, 0  ;;  %v1449_v53 = vsel %vm427_vm12, %v1425_v50, 0 }
 0xeac   :  { %1439 = vmatpush.bf16.msra.mxu2 %v1430_v52  ;;  %1458 = vmatpush.bf16.msra.mxu3 %v1449_v53  ;;  %v2220_v53 = vld [vmem:[%s2966_s19 + $0x78] sm:$0xff] }
 0xeaf   :  { %2076 = vmatmul.msk.bf16.vlgmr.msra.gmra.mxu2 %vm397_vm13, %v1422_v55  ;;  %2077 = vmatmul.msk.bf16.vlgmr.msra.gmra.mxu3 %vm397_vm13, %v1423_v54  ;;  %v2219_v54 = vld [vmem:[%s2966_s19 + $0x70] sm:$0xff]  ;;  %v2218_v55 = vld [vmem:[%s2966_s19 + $0x68] sm:$0xff] }
 0xeb0   :  { %1612 = vmatpush.bf16.msrb.mxu2 %v2212_v22  ;;  %1709 = vmatpush.bf16.msrb.mxu3 %v2220_v53 }
 0xeb4   :  { %1613 = vmatpush.bf16.msrb.mxu2 %v2211_v25  ;;  %1710 = vmatpush.bf16.msrb.mxu3 %v2219_v54 }
 0xeb8   :  { %1711 = vmatpush.bf16.msrb.mxu3 %v2218_v55 }
 0xebc   :  { %1712 = vmatpush.bf16.msrb.mxu3 %v2217_v56 }
 0xf32   :  { %v1441_v57 = vpop.f32.mrf.mxu2  ;;  %v1460_v59 = vpop.f32.mrf.mxu3 }
 0xf33   :  { %v1464_v60 = vpack.c.bf16 %v1460_v59, %v1441_v57  ;;  %v2216_v57 = vld [vmem:[%s2966_s19 + $0x58] sm:$0xff]  ;;  %v2215_v59 = vld [vmem:[%s2966_s19 + $0x50] sm:$0xff] }
 0xf34   :  { %1713 = vmatpush.bf16.msrb.mxu3 %v2216_v57 }
 0xf35   :  { %2084 = vmatmul.msk.bf16.vlgmr.msra.gmra.mxu0 %vm354_vm11, %v1464_v60  ;;  %v2214_v60 = vld [vmem:[%s2966_s19 + $0x48] sm:$0xff] }
 0xf38   :  { %1714 = vmatpush.bf16.msrb.mxu3 %v2215_v59 }
 0xf3a   :  { %v1443_v61 = vpop.f32.mrf.mxu2  ;;  %v1462_v0 = vpop.f32.mrf.mxu3 }
 0xf3b   :  { %v2213_v61 = vld [vmem:[%s2966_s19 + $0x40] sm:$0xff] }
 0xf3c   :  { %1715 = vmatpush.bf16.msrb.mxu3 %v2214_v60  ;;  %v2257_v0 = vld [vmem:[%s2995_s29 + $0x1] ss:$0 sm:$0xff] }
 0xf40   :  { %1716 = vmatpush.bf16.msrb.mxu3 %v2213_v61 }
 0xfb2   :  { %v1485_v3 = vpop.f32.mrf.mxu0 }
 0xfb3   :  { %v1509_v13 = vadd.f32 %v1508_v1, %v1485_v3 }
 0xfb5   :  { %v1518_v4 = vadd.f32 %v2254_v2, %v1509_v13 }
 0xfb7   :  { %v2861_v5 = vadd.f32 %v1518_v4, %v2721_v58 }
 0xfb9   :  { %v1526_v6 = vsel %vm182_vm3, %v2861_v5, 0.0 }
 0xfba   :  { %1527 = vadd.xlane.f32.xlu0 %v1526_v6  ;;  %v1487_v40 = vpop.f32.mrf.mxu0 }
 0xfbb   :  { %v1511_v8 = vadd.f32 %v1510_v7, %v1487_v40 }
 0xfbd   :  { %v1519_v9 = vadd.f32 %v2254_v2, %v1511_v8 }
 0xfbf   :  { %v2866_v10 = vadd.f32 %v1519_v9, %v2726_v62 }
 0xfc1   :  { %v1529_v11 = vsel %vm182_vm3, %v2866_v10, 0.0 }
 0xfc2   :  { %1530 = vadd.xlane.f32.xlu2 %v1529_v11 }
0x102d   :  { %v1528_v12 = vpop.xlane.xlu0 %1527 }
0x102e   :  { %v1532_v63 = vmul.f32 %v1528_v12, %v2517_v29 }
0x1030   :  { %v1534_v58 = vsub.f32 %v2861_v5, %v1532_v63 }
0x1032   :  { %v1536_v14 = vmul.f32 %v1534_v58, %v1534_v58 }
0x1034   :  { %v1538_v15 = vsel %vm182_vm3, %v1536_v14, 0.0 }
0x1035   :  { %1539 = vadd.xlane.f32.xlu1 %v1538_v15  ;;  %v1531_v16 = vpop.xlane.xlu2 %1530 }
0x1036   :  { %v1533_v17 = vmul.f32 %v1531_v16, %v2517_v29 }
0x1038   :  { %v1535_v19 = vsub.f32 %v2866_v10, %v1533_v17 }
0x103a   :  { %v1537_v62 = vmul.f32 %v1535_v19, %v1535_v19 }
0x103c   :  { %v1541_v20 = vsel %vm182_vm3, %v1537_v62, 0.0 }
0x103d   :  { %1542 = vadd.xlane.f32.xlu2 %v1541_v20 }
0x10a8   :  { %v1540_v23 = vpop.xlane.xlu1 %1539 }
0x10a9   :  { %v1544_v24 = vmul.f32 %v1540_v23, %v2517_v29 }
0x10ab   :  { %v1546_v51 = vadd.f32 1e-05, %v1544_v24  ;;  %v2258_v24 = vld [vmem:[%s2967_s20 + $0x1] ss:$0 sm:$0xff] }
0x10ad   :  { %2311 = vrsqrt.f32 %v1546_v51  ;;  %vm1554_vm12 = vweird.f32 %v1546_v51 }
0x10b0   :  { %v1543_v26 = vpop.xlane.xlu2 %1542 }
0x10b1   :  { %v1545_v27 = vmul.f32 %v1543_v26, %v2517_v29 }
0x10b3   :  { %v2312_v28 = vpop.eup %2311  ;;  %v1547_v30 = vadd.f32 1e-05, %v1545_v27 }
0x10b4   :  { %v1549_v31 = vmul.f32 %v2312_v28, %v1546_v51  ;;  %vm1555_vm11 = vweird.f32 %v2312_v28 }
0x10b5   :  { %2313 = vrsqrt.f32 %v1547_v30  ;;  %vm1556_vm13 = vmor %vm1554_vm12, %vm1555_vm11  ;;  %vm1564_vm15 = vweird.f32 %v1547_v30 }
0x10b6   :  { %v1550_v32 = vmul.f32 %v2312_v28, %v1549_v31 }
0x10b8   :  { %v1551_v33 = vmul.f32 0.5, %v1550_v32 }
0x10ba   :  { %v1552_v34 = vsub.f32 1.5, %v1551_v33 }
0x10bb   :  { %v2314_v35 = vpop.eup %2313 }
0x10bc   :  { %v1553_v36 = vmul.f32 %v2312_v28, %v1552_v34  ;;  %v1559_v37 = vmul.f32 %v2314_v35, %v1547_v30  ;;  %vm1565_vm14 = vweird.f32 %v2314_v35 }
0x10bd   :  { %vm1566_vm0 = vmor %vm1564_vm15, %vm1565_vm14 }
0x10be   :  { %v1560_v38 = vmul.f32 %v2314_v35, %v1559_v37  ;;  %v1557_v39 = vsel %vm1556_vm13, %v2312_v28, %v1553_v36 }
0x10bf   :  { %v1568_v43 = vmul.f32 %v1557_v39, %v1534_v58 }
0x10c0   :  { %v1561_v45 = vmul.f32 0.5, %v1560_v38 }
0x10c1   :  { %v1573_v47 = vmul.f32 %v2255_v42, %v1568_v43 }
0x10c2   :  { %v1562_v41 = vsub.f32 1.5, %v1561_v45 }
0x10c3   :  { %v1578_v21 = vadd.f32 %v2256_v46, %v1573_v47 }
0x10c4   :  { %v1563_v18 = vmul.f32 %v2314_v35, %v1562_v41 }
0x10c6   :  { %v1567_v44 = vsel %vm1566_vm0, %v2314_v35, %v1563_v18 }
0x10c7   :  { %v1569_v48 = vmul.f32 %v1567_v44, %v1535_v19  ;;  %v2221_v44 = vld [vmem:[%s2996_s25] sm:$0xff] }
0x10c9   :  { %v1574_v49 = vmul.f32 %v2255_v42, %v1569_v48 }
0x10cb   :  { %v1579_v50 = vadd.f32 %v2256_v46, %v1574_v49 }
0x10cd   :  { %v1580_v52 = vpack.c.bf16 %v1579_v50, %v1578_v21 }
0x10cf   :  { %2106 = vmatmul.msk.bf16.vlgmr.msrb.gmra.mxu2 %vm182_vm3, %v1580_v52 }
0x1152   :  { %v1615_v1 = vpop.f32.mrf.mxu2 }
0x1153   :  { %v1616_v2 = vadd.f32 %v2257_v0, %v1615_v1 }
0x1155   :  { %v1622_v3 = vmul.f32 0.044715, %v1616_v2  ;;  %v1620_v17 = vmul.f32 0.5, %v1616_v2 }
0x1157   :  { %v1624_v13 = vmul.f32 %v1622_v3, %v1616_v2  ;;  %v2260_v3 = vld [vmem:[%s2969_s22] ss:$0 sm:$0xff]  ;;  %s2354_s22 = smov 128  }
0x1159   :  { %v1626_v4 = vmul.f32 %v1624_v13, %v1616_v2 }
0x115a   :  { %v1617_v6 = vpop.f32.mrf.mxu2 }
0x115b   :  { %v1628_v7 = vadd.f32 %v1626_v4, %v1616_v2  ;;  %v1618_v40 = vadd.f32 %v2257_v0, %v1617_v6 }
0x115d   :  { %v1623_v8 = vmul.f32 0.044715, %v1618_v40  ;;  %v1630_v9 = vmul.f32 0.7978846, %v1628_v7  ;;  %v1621_v19 = vmul.f32 0.5, %v1618_v40 }
0x115f   :  { %v1625_v11 = vmul.f32 %v1623_v8, %v1618_v40  ;;  %2315 = vtanh.f32 %v1630_v9 }
0x1161   :  { %v1627_v12 = vmul.f32 %v1625_v11, %v1618_v40 }
0x1163   :  { %v1629_v63 = vadd.f32 %v1627_v12, %v1618_v40 }
0x1165   :  { %v1631_v58 = vmul.f32 0.7978846, %v1629_v63  ;;  %v2316_v14 = vpop.eup %2315 }
0x1166   :  { %v1634_v15 = vadd.f32 1.0, %v2316_v14 }
0x1167   :  { %2317 = vtanh.f32 %v1631_v58 }
0x1168   :  { %v1636_v20 = vmul.f32 %v1634_v15, %v1620_v17 }
0x116d   :  { %v2318_v16 = vpop.eup %2317 }
0x116e   :  { %v1635_v62 = vadd.f32 1.0, %v2318_v16 }
0x1170   :  { %v1637_v22 = vmul.f32 %v1635_v62, %v1621_v19 }
0x1172   :  { %v1638_v23 = vpack.c.bf16 %v1637_v22, %v1636_v20 }
0x1174   :  { %1717 = vmatmul.bf16.vlgmr.msrb.gmra.mxu3 %v1638_v23 }
0x11f7   :  { %v1718_v51 = vpop.f32.mrf.mxu3 }
0x11f8   :  { %v1719_v25 = vadd.f32 %v2258_v24, %v1718_v51 }
0x11fa   :  { %v1723_v26 = vadd.f32 %v1719_v25, %v2861_v5 }
0x11fc   :  { %v1727_v27 = vsel %vm182_vm3, %v1723_v26, 0.0 }
0x11fd   :  { %1728 = vadd.xlane.f32.xlu1 %v1727_v27 }
0x11ff   :  { %v1720_v28 = vpop.f32.mrf.mxu3 }
0x1200   :  { %v1721_v30 = vadd.f32 %v2258_v24, %v1720_v28 }
0x1202   :  { %v1724_v31 = vadd.f32 %v1721_v30, %v2866_v10  ;;  %v2222_v10 = vld [vmem:[%s2996_s25 + $0x8] sm:$0xff] }
0x1203   :  { %1807 = vmatpush.bf16.msrb.mxu0 %v2222_v10 }
0x1204   :  { %v1730_v32 = vsel %vm182_vm3, %v1724_v31, 0.0 }
0x1205   :  { %1731 = vadd.xlane.f32.xlu2 %v1730_v32 }
0x1207   :  { %1808 = vmatpush.bf16.msrb.mxu0 %v2221_v44 }
0x1270   :  { %v1729_v33 = vpop.xlane.xlu1 %1728 }
0x1271   :  { %v1733_v34 = vmul.f32 %v1729_v33, %v2517_v29 }
0x1273   :  { %v1735_v35 = vsub.f32 %v1723_v26, %v1733_v34 }
0x1275   :  { %v1737_v36 = vmul.f32 %v1735_v35, %v1735_v35 }
0x1277   :  { %v1739_v37 = vsel %vm182_vm3, %v1737_v36, 0.0 }
0x1278   :  { %v1732_v38 = vpop.xlane.xlu2 %1731  ;;  %1740 = vadd.xlane.f32.xlu1 %v1739_v37 }
0x1279   :  { %v1734_v5 = vmul.f32 %v1732_v38, %v2517_v29 }
0x127b   :  { %v1736_v39 = vsub.f32 %v1724_v31, %v1734_v5 }
0x127d   :  { %v1738_v45 = vmul.f32 %v1736_v39, %v1736_v39 }
0x127f   :  { %v1742_v41 = vsel %vm182_vm3, %v1738_v45, 0.0 }
0x1280   :  { %1743 = vadd.xlane.f32.xlu2 %v1742_v41 }
0x12eb   :  { %v1741_v42 = vpop.xlane.xlu1 %1740 }
0x12ec   :  { %v1745_v43 = vmul.f32 %v1741_v42, %v2517_v29 }
0x12ee   :  { %v1747_v18 = vadd.f32 1e-05, %v1745_v43 }
0x12f0   :  { %2319 = vrsqrt.f32 %v1747_v18  ;;  %vm1755_vm2 = vweird.f32 %v1747_v18 }
0x12f3   :  { %v1744_v46 = vpop.xlane.xlu2 %1743 }
0x12f4   :  { %v1746_v47 = vmul.f32 %v1744_v46, %v2517_v29  ;;  %v2259_v29 = vld [vmem:[%s2968_s21] ss:$0 sm:$0xff]  ;;  %s2353_s21 = smov [#allocation2]  }
0x12f5   :  { %s1821_s11 = sshll.u32 %s2353_s21, 4  ;;  %s1822_s11 = int_to_ptr.vmem [resolvable:$true] %s1821_s11 }
0x12f6   :  { %v2320_v48 = vpop.eup %2319  ;;  %v1748_v49 = vadd.f32 1e-05, %v1746_v47 }
0x12f7   :  { %v1750_v21 = vmul.f32 %v2320_v48, %v1747_v18  ;;  %vm1756_vm1 = vweird.f32 %v2320_v48 }
0x12f8   :  { %2321 = vrsqrt.f32 %v1748_v49  ;;  %vm1757_vm4 = vmor %vm1755_vm2, %vm1756_vm1  ;;  %vm1765_vm6 = vweird.f32 %v1748_v49 }
0x12f9   :  { %v1751_v50 = vmul.f32 %v2320_v48, %v1750_v21 }
0x12fb   :  { %v1752_v52 = vmul.f32 0.5, %v1751_v50 }
0x12fd   :  { %v1753_v53 = vsub.f32 1.5, %v1752_v52 }
0x12fe   :  { %v2322_v54 = vpop.eup %2321 }
0x12ff   :  { %v1754_v55 = vmul.f32 %v2320_v48, %v1753_v53  ;;  %v1760_v56 = vmul.f32 %v2322_v54, %v1748_v49  ;;  %vm1766_vm5 = vweird.f32 %v2322_v54 }
0x1300   :  { %vm1767_vm7 = vmor %vm1765_vm6, %vm1766_vm5 }
0x1301   :  { %v1761_v57 = vmul.f32 %v2322_v54, %v1760_v56  ;;  %v1758_v59 = vsel %vm1757_vm4, %v2320_v48, %v1754_v55 }
0x1302   :  { %v1769_v0 = vmul.f32 %v1758_v59, %v1735_v35 }
0x1303   :  { %v1762_v60 = vmul.f32 0.5, %v1761_v57 }
0x1304   :  { %v1774_v13 = vmul.f32 %v2259_v29, %v1769_v0 }
0x1305   :  { %v1763_v61 = vsub.f32 1.5, %v1762_v60 }
0x1306   :  { %v1779_v7 = vadd.f32 %v2260_v3, %v1774_v13 }
0x1307   :  { %v1764_v1 = vmul.f32 %v2322_v54, %v1763_v61 }
0x1309   :  { %v1768_v2 = vsel %vm1767_vm7, %v2322_v54, %v1764_v1 }
0x130a   :  { %v1770_v4 = vmul.f32 %v1768_v2, %v1736_v39 }
0x130c   :  { %v1775_v6 = vmul.f32 %v2259_v29, %v1770_v4 }
0x130e   :  { %v1780_v40 = vadd.f32 %v2260_v3, %v1775_v6 }
0x1310   :  { %v1781_v8 = vpack.c.bf16 %v1780_v40, %v1779_v7 }
0x1312   :  { %2164 = vmatmul.msk.bf16.vlgmr.msrb.gmra.mxu0 %vm182_vm3, %v1781_v8 }
0x138f   :  { %v1810_v9 = vpop.f32.mrf.mxu0 }
0x1390   :  { %1815 = vst [vmem:[#allocation2] sm:$0xff] %v1810_v9 }
0x1397   :  { %v1812_v11 = vpop.f32.mrf.mxu0 }
0x1398   :  { %1816 = vst [vmem:[#allocation2 + $0x8] sm:$0xff] %v1812_v11 }
0x1399   :  { %1829 = dma.vmem_to_hbm [thread:$0]  %s1822_s11, 256, %s1824_s10, [#allocation3], %s2354_s22, %s2354_s22, %s2355_s16  }
0x139a   :  { %2347 = dma.done.wait [#allocation3], 256  }
0x139b   :  { %2348 = vsyncadd [#allocation3], 4294967040 }
0x139c   :  { %1834 = vsyncpa [#allocation3], 1 }

</bundles_post_ra>
